<compile_context>
chip_gen: v5e
topology: v5e:2x2
jax: 0.10.0
libtpu: 0.0.40
codegen_flags: <defaults>
</compile_context>

<pallas_src>
import functools

import jax
import jax.numpy as jnp
import numpy as np
from jax.experimental import pallas as pl
from jax.experimental.pallas import tpu as pltpu


# ----------------------------------------------------------------------------
# Fused conv3x3x3(+stride) + folded-BN + (residual / 1x1x1 projection) + ReLU.
#   grid = (N, Do)          -- both axes parallel; no reduction grid axis
#   x0/x1/x2 : the three padded input depth planes (phase-split for stride)
#   w        : folded weights reshaped to (27*Cin, Cout), resident in VMEM
#   out      : one flattened output plane (Ho*Wo, Cout)
# ----------------------------------------------------------------------------
def _conv_bn_kernel(s, Hq, Wq, Ho, Wo, do_relu, res_mode, *refs):
    # res_mode: 0 = no residual, 1 = identity residual, 2 = 1x1x1 projection.
    if res_mode == 0:
        x0, x1, x2, w_ref, b_ref, o_ref = refs
        r_ref = wsc_ref = bsc_ref = None
    elif res_mode == 1:
        x0, x1, x2, w_ref, b_ref, r_ref, o_ref = refs
        wsc_ref = bsc_ref = None
    else:
        x0, x1, x2, w_ref, b_ref, r_ref, wsc_ref, bsc_ref, o_ref = refs

    cin = x0.shape[-1]
    M = Ho * Wo

    # In-kernel im2col: 27 statically-unrolled taps concatenated along the
    # contraction axis -> a single K = 27*Cin MXU matmul.  With the phase-split
    # layout a stride-s tap (kh, kw) is an UNSTRIDED slice at offset
    # (rh*Hq + qh, rw*Wq + qw) where kh = s*qh + rh, so no strided loads.
    taps = []
    for x_ref in (x0, x1, x2):            # kd = 0, 1, 2 handled in-kernel
        plane = x_ref[0, 0]               # (s*Hq, s*Wq, Cin)
        for kh in range(3):
            h0 = (kh % s) * Hq + (kh // s)
            for kw in range(3):
                w0 = (kw % s) * Wq + (kw // s)
                taps.append(plane[h0:h0 + Ho, w0:w0 + Wo, :].reshape(M, cin))
    lhs = jnp.concatenate(taps, axis=-1)                   # (M, 27*Cin) bf16

    out = jnp.dot(lhs, w_ref[...], preferred_element_type=jnp.float32)
    out = out + b_ref[...]

    if res_mode == 1:
        out = out + r_ref[0, 0].astype(jnp.float32)        # identity shortcut
    elif res_mode == 2:                                     # 1x1x1 conv + BN
        out = out + (jnp.dot(r_ref[0, 0], wsc_ref[...],
                             preferred_element_type=jnp.float32) + bsc_ref[...])
    if do_relu:
        out = jnp.maximum(out, 0.0)
    o_ref[0, 0] = out.astype(o_ref.dtype)


# ----------------------------------------------------------------------------
# Wrapper: phase-split padding + pallas_call plumbing.
# ----------------------------------------------------------------------------
def _phase_split(x, stride, pad):
    """(N,D,H,W,C) -> (N, Dp, s*Hq, s*Wq, C) with H/W split into `stride` phases."""
    N, D, H, W, C = x.shape
    s = stride
    Do = (D + 2 * pad - 3) // s + 1
    Ho = (H + 2 * pad - 3) // s + 1
    Wo = (W + 2 * pad - 3) // s + 1
    Dp, Hp, Wp = D + 2 * pad, H + 2 * pad, W + 2 * pad
    if s == 1:
        # Phase-split is a no-op for stride 1: pad only (no reshape/transpose).
        x = jnp.pad(x, ((0, 0), (pad, pad), (pad, pad), (pad, pad), (0, 0)))
        return x, (Do, Ho, Wo, Hp, Wp)
    Hq, Wq = pl.cdiv(Hp, s), pl.cdiv(Wp, s)
    x = jnp.pad(x, ((0, 0), (pad, pad),
                    (pad, pad + Hq * s - Hp),
                    (pad, pad + Wq * s - Wp), (0, 0)))
    x = x.reshape(N, Dp, Hq, s, Wq, s, C)
    x = jnp.transpose(x, (0, 1, 3, 2, 5, 4, 6))            # phases outermost
    x = x.reshape(N, Dp, s * Hq, s * Wq, C)
    return x, (Do, Ho, Wo, Hq, Wq)


def conv3x3_bn(x, w, scale, bias, stride, relu=True, residual=None,
               shortcut=None, out_dtype=jnp.float32):
    """Fused 3x3x3 conv (pad=1) + folded BN + optional shortcut + ReLU.

    x: (N,D,H,W,Cin) (cast to bf16 for the MXU).  w: (3,3,3,Cin,Cout).
    scale/bias: (Cout,) folded BN.  residual: (N,Do,Ho,Wo,Cr) added before the
    ReLU; with shortcut=(w_sc, b_sc) it is projected (1x1x1 conv + BN) in-kernel.
    Returns (N,Do,Ho,Wo,Cout) in out_dtype.
    """
    N = x.shape[0]
    Cin = x.shape[-1]
    Cout = w.shape[-1]
    s = stride

    # Fold BN scale into the weights and flatten to the fused-K (27*Cin, Cout)
    # layout expected by the single in-kernel matmul.  Kernel only adds bias.
    w_f = (w * scale.reshape(1, 1, 1, 1, Cout)).reshape(27 * Cin, Cout)
    w_f = w_f.astype(jnp.bfloat16)
    b2d = bias.reshape(1, Cout).astype(jnp.float32)

    x_ph, (Do, Ho, Wo, Hq, Wq) = _phase_split(x.astype(jnp.bfloat16), s, 1)
    M = Ho * Wo

    # Three views of the same padded array deliver the 3 depth taps per step.
    in_specs = []
    args = []
    for kd in range(3):
        in_specs.append(pl.BlockSpec(
            (1, 1, s * Hq, s * Wq, Cin),
            lambda n, do, kd=kd: (n, do * s + kd, 0, 0, 0)))
        args.append(x_ph)
    in_specs += [
        pl.BlockSpec((27 * Cin, Cout), lambda n, do: (0, 0)),  # resident weights
        pl.BlockSpec((1, Cout), lambda n, do: (0, 0)),
    ]
    args += [w_f, b2d]

    res_mode = 0
    if residual is not None:
        Cr = residual.shape[-1]
        r2 = residual.reshape(N, Do, M, Cr).astype(jnp.bfloat16)
        args.append(r2)
        in_specs.append(pl.BlockSpec((1, 1, M, Cr), lambda n, do: (n, do, 0, 0)))
        if shortcut is None:
            res_mode = 1
        else:
            res_mode = 2
            w_sc, b_sc = shortcut
            args += [w_sc.astype(jnp.bfloat16),
                     b_sc.reshape(1, Cout).astype(jnp.float32)]
            in_specs += [
                pl.BlockSpec((Cr, Cout), lambda n, do: (0, 0)),
                pl.BlockSpec((1, Cout), lambda n, do: (0, 0)),
            ]

    kernel = functools.partial(_conv_bn_kernel, s, Hq, Wq, Ho, Wo, relu, res_mode)
    out = pl.pallas_call(
        kernel,
        out_shape=jax.ShapeDtypeStruct((N, Do, M, Cout), out_dtype),
        grid=(N, Do),
        in_specs=in_specs,
        out_specs=pl.BlockSpec((1, 1, M, Cout), lambda n, do: (n, do, 0, 0)),
        compiler_params=pltpu.CompilerParams(
            dimension_semantics=("parallel", "parallel")),
    )(*args)
    return out.reshape(N, Do, Ho, Wo, Cout)


# ----------------------------------------------------------------------------
# Parameter setup and the ResNetBlock forward.
# ----------------------------------------------------------------------------
def init_block_params(key, cin, cout, stride):
    keys = jax.random.split(key, 6)

    def bn_fold(k, c):
        k1, k2, k3, k4 = jax.random.split(k, 4)
        gamma = jax.random.uniform(k1, (c,), minval=0.5, maxval=1.5, dtype=jnp.float32)
        beta = 0.1 * jax.random.normal(k2, (c,), dtype=jnp.float32)
        mean = 0.1 * jax.random.normal(k3, (c,), dtype=jnp.float32)
        var = jax.random.uniform(k4, (c,), minval=0.5, maxval=1.5, dtype=jnp.float32)
        scale = gamma / jnp.sqrt(var + 1e-5)
        bias = beta - mean * scale
        return scale, bias

    proj = (cin != cout) or (stride != 1)
    p = {"proj": proj}
    p["w1"] = 0.05 * jax.random.normal(keys[0], (3, 3, 3, cin, cout), dtype=jnp.float32)
    p["s1"], p["b1"] = bn_fold(keys[1], cout)
    p["w2"] = 0.05 * jax.random.normal(keys[2], (3, 3, 3, cout, cout), dtype=jnp.float32)
    p["s2"], p["b2"] = bn_fold(keys[3], cout)
    if proj:
        p["ws"] = 0.2 * jax.random.normal(keys[4], (1, 1, 1, cin, cout), dtype=jnp.float32)
        p["ss"], p["bs"] = bn_fold(keys[5], cout)
    return p


def resnet_block_pallas(x_ncdhw, params, stride):
    # NCDHW (PyTorch) -> NDHWC internally -> NCDHW out.
    x = jnp.transpose(x_ncdhw, (0, 2, 3, 4, 1)).astype(jnp.float32)
    # Round the block input to bf16 once (MXU-native); accumulation stays f32.
    x = x.astype(jnp.bfloat16)
    Cin = x.shape[-1]
    Cout = params["w1"].shape[-1]

    # conv1 (3x3x3, stride, pad=1) + bn1 + relu — y1 emitted directly in bf16.
    y1 = conv3x3_bn(x, params["w1"], params["s1"], params["b1"], stride,
                    relu=True, out_dtype=jnp.bfloat16)

    # conv2 (3x3x3, stride 1, pad=1) + bn2 + shortcut + relu — one fused call.
    if params["proj"]:
        x_sc = x[:, ::stride, ::stride, ::stride, :]      # 1x1x1/stride sampling
        w_sc = params["ws"].reshape(Cin, Cout) * params["ss"][None, :]
        out = conv3x3_bn(y1, params["w2"], params["s2"], params["b2"], 1,
                         relu=True, residual=x_sc,
                         shortcut=(w_sc, params["bs"]), out_dtype=jnp.float32)
    else:
        out = conv3x3_bn(y1, params["w2"], params["s2"], params["b2"], 1,
                         relu=True, residual=x, out_dtype=jnp.float32)
    return jnp.transpose(out, (0, 4, 1, 2, 3))


# ----------------------------------------------------------------------------
# Pure-JAX reference (correctness check only; uses identical bf16 rounding).
# ----------------------------------------------------------------------------
def _conv3d_ref(x, w, stride, pad):
    return jax.lax.conv_general_dilated(
        x, w, window_strides=(stride, stride, stride),
        padding=[(pad, pad)] * 3,
        dimension_numbers=("NDHWC", "DHWIO", "NDHWC"),
        precision=jax.lax.Precision.HIGHEST)


def resnet_block_ref(x_ncdhw, params, stride):
    rb = lambda a: a.astype(jnp.bfloat16).astype(jnp.float32)
    x = rb(jnp.transpose(x_ncdhw, (0, 2, 3, 4, 1)).astype(jnp.float32))
    y1 = jnp.maximum(_conv3d_ref(x, rb(params["w1"] * params["s1"]), stride, 1)
                     + params["b1"], 0.0)
    if params["proj"]:
        ident = _conv3d_ref(x, rb(params["ws"] * params["ss"]), stride, 0) + params["bs"]
    else:
        ident = x
    y2 = _conv3d_ref(rb(y1), rb(params["w2"] * params["s2"]), 1, 1) + params["b2"]
    out = jnp.maximum(y2 + ident, 0.0)
    return jnp.transpose(out, (0, 4, 1, 2, 3))


if __name__ == "__main__":
    key = jax.random.PRNGKey(0)
    kx, kp1, kp2 = jax.random.split(key, 3)

    # Input in PyTorch NCDHW layout: (N=2, C=8, D=16, H=16, W=16)
    x = jax.random.normal(kx, (2, 8, 16, 16, 16), dtype=jnp.float32)

    # Block with projection shortcut (in!=out, stride=2), as in layer2..4 first block.
    params_a = init_block_params(kp1, cin=8, cout=16, stride=2)
    out_a = resnet_block_pallas(x, params_a, stride=2)
    ref_a = resnet_block_ref(x, params_a, stride=2)

    # Identity-shortcut block (in==out, stride=1), as in subsequent blocks.
    # Compare against the reference applied to the SAME (Pallas) input so the
    # bf16 re-rounding of the block input is bit-identical on both sides.
    params_b = init_block_params(kp2, cin=16, cout=16, stride=1)
    out_b = resnet_block_pallas(out_a, params_b, stride=1)
    ref_b = resnet_block_ref(out_a, params_b, stride=1)

    jax.block_until_ready((out_a, out_b))
    assert out_a.shape == (2, 16, 8, 8, 8)
    assert out_b.shape == (2, 16, 8, 8, 8)
    np.testing.assert_allclose(np.asarray(out_a), np.asarray(ref_a), rtol=5e-3, atol=5e-3)
    np.testing.assert_allclose(np.asarray(out_b), np.asarray(ref_b), rtol=5e-3, atol=5e-3)
    print("KERNEL_OK")
</pallas_src>

<mosaic_0001>
module attributes {stable_mosaic.version = 11 : i64} {
  func.func @_conv_bn_kernel(%arg0: i32, %arg1: i32, %arg2: memref<1x1x18x18x8xbf16, #tpu.memory_space<vmem>>, %arg3: memref<1x1x18x18x8xbf16, #tpu.memory_space<vmem>>, %arg4: memref<1x1x18x18x8xbf16, #tpu.memory_space<vmem>>, %arg5: memref<216x16xbf16, #tpu.memory_space<vmem>>, %arg6: memref<1x16xf32, #tpu.memory_space<vmem>>, %arg7: memref<1x1x64x16xbf16, #tpu.memory_space<vmem>>) attributes {dimension_semantics = [#tpu.dimension_semantics<parallel>, #tpu.dimension_semantics<parallel>], iteration_bounds = array<i64: 2, 8>, scalar_prefetch = 0 : i64, scratch_operands = 0 : i64, tpu.core_type = #tpu.core_type<tc>, window_params = [{transform_indices = @transform_0, window_bounds = array<i64: 1, 1, 18, 18, 8>}, {transform_indices = @transform_1, window_bounds = array<i64: 1, 1, 18, 18, 8>}, {transform_indices = @transform_2, window_bounds = array<i64: 1, 1, 18, 18, 8>}, {pipeline_mode = #tpu.pipeline_mode<synchronous>, transform_indices = @transform_3, window_bounds = array<i64: 216, 16>}, {pipeline_mode = #tpu.pipeline_mode<synchronous>, transform_indices = @transform_4, window_bounds = array<i64: 1, 16>}, {transform_indices = @transform_5, window_bounds = array<i64: 1, 1, 64, 16>}]} {
    %c0 = arith.constant 0 : index
    %c0_0 = arith.constant 0 : index
    %c0_1 = arith.constant 0 : index
    %c0_2 = arith.constant 0 : index
    %c0_3 = arith.constant 0 : index
    %0 = vector.load %arg2[%c0, %c0_0, %c0_1, %c0_2, %c0_3] : memref<1x1x18x18x8xbf16, #tpu.memory_space<vmem>>, vector<1x1x18x18x8xbf16>
    %1 = vector.shape_cast %0 : vector<1x1x18x18x8xbf16> to vector<18x18x8xbf16>
    %2 = vector.extract_strided_slice %1 {offsets = [0, 0, 0], sizes = [8, 8, 8], strides = [1, 1, 1]} : vector<18x18x8xbf16> to vector<8x8x8xbf16>
    %3 = vector.shape_cast %2 : vector<8x8x8xbf16> to vector<64x8xbf16>
    %4 = vector.extract_strided_slice %1 {offsets = [0, 9, 0], sizes = [8, 8, 8], strides = [1, 1, 1]} : vector<18x18x8xbf16> to vector<8x8x8xbf16>
    %5 = vector.shape_cast %4 : vector<8x8x8xbf16> to vector<64x8xbf16>
    %6 = vector.extract_strided_slice %1 {offsets = [0, 1, 0], sizes = [8, 8, 8], strides = [1, 1, 1]} : vector<18x18x8xbf16> to vector<8x8x8xbf16>
    %7 = vector.shape_cast %6 : vector<8x8x8xbf16> to vector<64x8xbf16>
    %8 = vector.extract_strided_slice %1 {offsets = [9, 0, 0], sizes = [8, 8, 8], strides = [1, 1, 1]} : vector<18x18x8xbf16> to vector<8x8x8xbf16>
    %9 = vector.shape_cast %8 : vector<8x8x8xbf16> to vector<64x8xbf16>
    %10 = vector.extract_strided_slice %1 {offsets = [9, 9, 0], sizes = [8, 8, 8], strides = [1, 1, 1]} : vector<18x18x8xbf16> to vector<8x8x8xbf16>
    %11 = vector.shape_cast %10 : vector<8x8x8xbf16> to vector<64x8xbf16>
    %12 = vector.extract_strided_slice %1 {offsets = [9, 1, 0], sizes = [8, 8, 8], strides = [1, 1, 1]} : vector<18x18x8xbf16> to vector<8x8x8xbf16>
    %13 = vector.shape_cast %12 : vector<8x8x8xbf16> to vector<64x8xbf16>
    %14 = vector.extract_strided_slice %1 {offsets = [1, 0, 0], sizes = [8, 8, 8], strides = [1, 1, 1]} : vector<18x18x8xbf16> to vector<8x8x8xbf16>
    %15 = vector.shape_cast %14 : vector<8x8x8xbf16> to vector<64x8xbf16>
    %16 = vector.extract_strided_slice %1 {offsets = [1, 9, 0], sizes = [8, 8, 8], strides = [1, 1, 1]} : vector<18x18x8xbf16> to vector<8x8x8xbf16>
    %17 = vector.shape_cast %16 : vector<8x8x8xbf16> to vector<64x8xbf16>
    %18 = vector.extract_strided_slice %1 {offsets = [1, 1, 0], sizes = [8, 8, 8], strides = [1, 1, 1]} : vector<18x18x8xbf16> to vector<8x8x8xbf16>
    %19 = vector.shape_cast %18 : vector<8x8x8xbf16> to vector<64x8xbf16>
    %c0_4 = arith.constant 0 : index
    %c0_5 = arith.constant 0 : index
    %c0_6 = arith.constant 0 : index
    %c0_7 = arith.constant 0 : index
    %c0_8 = arith.constant 0 : index
    %20 = vector.load %arg3[%c0_4, %c0_5, %c0_6, %c0_7, %c0_8] : memref<1x1x18x18x8xbf16, #tpu.memory_space<vmem>>, vector<1x1x18x18x8xbf16>
    %21 = vector.shape_cast %20 : vector<1x1x18x18x8xbf16> to vector<18x18x8xbf16>
    %22 = vector.extract_strided_slice %21 {offsets = [0, 0, 0], sizes = [8, 8, 8], strides = [1, 1, 1]} : vector<18x18x8xbf16> to vector<8x8x8xbf16>
    %23 = vector.shape_cast %22 : vector<8x8x8xbf16> to vector<64x8xbf16>
    %24 = vector.extract_strided_slice %21 {offsets = [0, 9, 0], sizes = [8, 8, 8], strides = [1, 1, 1]} : vector<18x18x8xbf16> to vector<8x8x8xbf16>
    %25 = vector.shape_cast %24 : vector<8x8x8xbf16> to vector<64x8xbf16>
    %26 = vector.extract_strided_slice %21 {offsets = [0, 1, 0], sizes = [8, 8, 8], strides = [1, 1, 1]} : vector<18x18x8xbf16> to vector<8x8x8xbf16>
    %27 = vector.shape_cast %26 : vector<8x8x8xbf16> to vector<64x8xbf16>
    %28 = vector.extract_strided_slice %21 {offsets = [9, 0, 0], sizes = [8, 8, 8], strides = [1, 1, 1]} : vector<18x18x8xbf16> to vector<8x8x8xbf16>
    %29 = vector.shape_cast %28 : vector<8x8x8xbf16> to vector<64x8xbf16>
    %30 = vector.extract_strided_slice %21 {offsets = [9, 9, 0], sizes = [8, 8, 8], strides = [1, 1, 1]} : vector<18x18x8xbf16> to vector<8x8x8xbf16>
    %31 = vector.shape_cast %30 : vector<8x8x8xbf16> to vector<64x8xbf16>
    %32 = vector.extract_strided_slice %21 {offsets = [9, 1, 0], sizes = [8, 8, 8], strides = [1, 1, 1]} : vector<18x18x8xbf16> to vector<8x8x8xbf16>
    %33 = vector.shape_cast %32 : vector<8x8x8xbf16> to vector<64x8xbf16>
    %34 = vector.extract_strided_slice %21 {offsets = [1, 0, 0], sizes = [8, 8, 8], strides = [1, 1, 1]} : vector<18x18x8xbf16> to vector<8x8x8xbf16>
    %35 = vector.shape_cast %34 : vector<8x8x8xbf16> to vector<64x8xbf16>
    %36 = vector.extract_strided_slice %21 {offsets = [1, 9, 0], sizes = [8, 8, 8], strides = [1, 1, 1]} : vector<18x18x8xbf16> to vector<8x8x8xbf16>
    %37 = vector.shape_cast %36 : vector<8x8x8xbf16> to vector<64x8xbf16>
    %38 = vector.extract_strided_slice %21 {offsets = [1, 1, 0], sizes = [8, 8, 8], strides = [1, 1, 1]} : vector<18x18x8xbf16> to vector<8x8x8xbf16>
    %39 = vector.shape_cast %38 : vector<8x8x8xbf16> to vector<64x8xbf16>
    %c0_9 = arith.constant 0 : index
    %c0_10 = arith.constant 0 : index
    %c0_11 = arith.constant 0 : index
    %c0_12 = arith.constant 0 : index
    %c0_13 = arith.constant 0 : index
    %40 = vector.load %arg4[%c0_9, %c0_10, %c0_11, %c0_12, %c0_13] : memref<1x1x18x18x8xbf16, #tpu.memory_space<vmem>>, vector<1x1x18x18x8xbf16>
    %41 = vector.shape_cast %40 : vector<1x1x18x18x8xbf16> to vector<18x18x8xbf16>
    %42 = vector.extract_strided_slice %41 {offsets = [0, 0, 0], sizes = [8, 8, 8], strides = [1, 1, 1]} : vector<18x18x8xbf16> to vector<8x8x8xbf16>
    %43 = vector.shape_cast %42 : vector<8x8x8xbf16> to vector<64x8xbf16>
    %44 = vector.extract_strided_slice %41 {offsets = [0, 9, 0], sizes = [8, 8, 8], strides = [1, 1, 1]} : vector<18x18x8xbf16> to vector<8x8x8xbf16>
    %45 = vector.shape_cast %44 : vector<8x8x8xbf16> to vector<64x8xbf16>
    %46 = vector.extract_strided_slice %41 {offsets = [0, 1, 0], sizes = [8, 8, 8], strides = [1, 1, 1]} : vector<18x18x8xbf16> to vector<8x8x8xbf16>
    %47 = vector.shape_cast %46 : vector<8x8x8xbf16> to vector<64x8xbf16>
    %48 = vector.extract_strided_slice %41 {offsets = [9, 0, 0], sizes = [8, 8, 8], strides = [1, 1, 1]} : vector<18x18x8xbf16> to vector<8x8x8xbf16>
    %49 = vector.shape_cast %48 : vector<8x8x8xbf16> to vector<64x8xbf16>
    %50 = vector.extract_strided_slice %41 {offsets = [9, 9, 0], sizes = [8, 8, 8], strides = [1, 1, 1]} : vector<18x18x8xbf16> to vector<8x8x8xbf16>
    %51 = vector.shape_cast %50 : vector<8x8x8xbf16> to vector<64x8xbf16>
    %52 = vector.extract_strided_slice %41 {offsets = [9, 1, 0], sizes = [8, 8, 8], strides = [1, 1, 1]} : vector<18x18x8xbf16> to vector<8x8x8xbf16>
    %53 = vector.shape_cast %52 : vector<8x8x8xbf16> to vector<64x8xbf16>
    %54 = vector.extract_strided_slice %41 {offsets = [1, 0, 0], sizes = [8, 8, 8], strides = [1, 1, 1]} : vector<18x18x8xbf16> to vector<8x8x8xbf16>
    %55 = vector.shape_cast %54 : vector<8x8x8xbf16> to vector<64x8xbf16>
    %56 = vector.extract_strided_slice %41 {offsets = [1, 9, 0], sizes = [8, 8, 8], strides = [1, 1, 1]} : vector<18x18x8xbf16> to vector<8x8x8xbf16>
    %57 = vector.shape_cast %56 : vector<8x8x8xbf16> to vector<64x8xbf16>
    %58 = vector.extract_strided_slice %41 {offsets = [1, 1, 0], sizes = [8, 8, 8], strides = [1, 1, 1]} : vector<18x18x8xbf16> to vector<8x8x8xbf16>
    %59 = vector.shape_cast %58 : vector<8x8x8xbf16> to vector<64x8xbf16>
    %60 = tpu.concatenate %3, %5, %7, %9, %11, %13, %15, %17, %19, %23, %25, %27, %29, %31, %33, %35 in 1 : vector<64x8xbf16>, vector<64x8xbf16>, vector<64x8xbf16>, vector<64x8xbf16>, vector<64x8xbf16>, vector<64x8xbf16>, vector<64x8xbf16>, vector<64x8xbf16>, vector<64x8xbf16>, vector<64x8xbf16>, vector<64x8xbf16>, vector<64x8xbf16>, vector<64x8xbf16>, vector<64x8xbf16>, vector<64x8xbf16>, vector<64x8xbf16> -> vector<64x128xbf16>
    %61 = tpu.concatenate %37, %39, %43, %45, %47, %49, %51, %53, %55, %57, %59 in 1 : vector<64x8xbf16>, vector<64x8xbf16>, vector<64x8xbf16>, vector<64x8xbf16>, vector<64x8xbf16>, vector<64x8xbf16>, vector<64x8xbf16>, vector<64x8xbf16>, vector<64x8xbf16>, vector<64x8xbf16>, vector<64x8xbf16> -> vector<64x88xbf16>
    %62 = tpu.concatenate %60, %61 in 1 : vector<64x128xbf16>, vector<64x88xbf16> -> vector<64x216xbf16>
    %c0_14 = arith.constant 0 : index
    %c0_15 = arith.constant 0 : index
    %63 = vector.load %arg5[%c0_14, %c0_15] : memref<216x16xbf16, #tpu.memory_space<vmem>>, vector<216x16xbf16>
    %cst = arith.constant dense<0.000000e+00> : vector<64x16xf32>
    %64 = tpu.matmul %62, %63, %cst {dimension_numbers = #tpu.dot_dimension_numbers<[1], [0], [0], [1], [0, 0, 1, 1], [], []>} : vector<64x216xbf16>, vector<216x16xbf16>, vector<64x16xf32> -> vector<64x16xf32>
    %c0_16 = arith.constant 0 : index
    %c0_17 = arith.constant 0 : index
    %65 = vector.load %arg6[%c0_16, %c0_17] : memref<1x16xf32, #tpu.memory_space<vmem>>, vector<1x16xf32>
    %66 = vector.broadcast %65 : vector<1x16xf32> to vector<64x16xf32>
    %67 = arith.addf %64, %66 : vector<64x16xf32>
    %cst_18 = arith.constant 0.000000e+00 : f32
    %68 = vector.broadcast %cst_18 : f32 to vector<64x16xf32>
    %69 = arith.maximumf %67, %68 : vector<64x16xf32>
    %70 = arith.truncf %69 : vector<64x16xf32> to vector<64x16xbf16>
    %c0_19 = arith.constant 0 : index
    %c0_20 = arith.constant 0 : index
    %c0_21 = arith.constant 0 : index
    %c0_22 = arith.constant 0 : index
    %71 = vector.load %arg7[%c0_19, %c0_20, %c0_21, %c0_22] : memref<1x1x64x16xbf16, #tpu.memory_space<vmem>>, vector<1x1x64x16xbf16>
    %72 = vector.shape_cast %71 : vector<1x1x64x16xbf16> to vector<64x16xbf16>
    %73 = vector.shape_cast %70 : vector<64x16xbf16> to vector<1x1x64x16xbf16>
    tpu.vector_store %arg7[%c0_19, %c0_20, %c0_21, %c0_22], %73 {strides = array<i32>} : memref<1x1x64x16xbf16, #tpu.memory_space<vmem>>, vector<1x1x64x16xbf16>,
    return
  }
  func.func @transform_0(%arg0: i32, %arg1: i32) -> (i32, i32, i32, i32, i32) {
    %c2_i32 = arith.constant 2 : i32
    %0 = arith.muli %arg1, %c2_i32 : i32
    %c0_i32 = arith.constant 0 : i32
    %1 = arith.addi %0, %c0_i32 : i32
    %c0_i32_0 = arith.constant 0 : i32
    %c0_i32_1 = arith.constant 0 : i32
    %c0_i32_2 = arith.constant 0 : i32
    %c0_i32_3 = arith.constant 0 : i32
    return %arg0, %1, %c0_i32_0, %c0_i32_1, %c0_i32_2 : i32, i32, i32, i32, i32
  }
  func.func @transform_1(%arg0: i32, %arg1: i32) -> (i32, i32, i32, i32, i32) {
    %c2_i32 = arith.constant 2 : i32
    %0 = arith.muli %arg1, %c2_i32 : i32
    %c1_i32 = arith.constant 1 : i32
    %1 = arith.addi %0, %c1_i32 : i32
    %c0_i32 = arith.constant 0 : i32
    %c0_i32_0 = arith.constant 0 : i32
    %c0_i32_1 = arith.constant 0 : i32
    %c0_i32_2 = arith.constant 0 : i32
    return %arg0, %1, %c0_i32, %c0_i32_0, %c0_i32_1 : i32, i32, i32, i32, i32
  }
  func.func @transform_2(%arg0: i32, %arg1: i32) -> (i32, i32, i32, i32, i32) {
    %c2_i32 = arith.constant 2 : i32
    %0 = arith.muli %arg1, %c2_i32 : i32
    %c2_i32_0 = arith.constant 2 : i32
    %1 = arith.addi %0, %c2_i32_0 : i32
    %c0_i32 = arith.constant 0 : i32
    %c0_i32_1 = arith.constant 0 : i32
    %c0_i32_2 = arith.constant 0 : i32
    %c0_i32_3 = arith.constant 0 : i32
    return %arg0, %1, %c0_i32, %c0_i32_1, %c0_i32_2 : i32, i32, i32, i32, i32
  }
  func.func @transform_3(%arg0: i32, %arg1: i32) -> (i32, i32) {
    %c0_i32 = arith.constant 0 : i32
    %c0_i32_0 = arith.constant 0 : i32
    %c0_i32_1 = arith.constant 0 : i32
    return %c0_i32, %c0_i32_0 : i32, i32
  }
  func.func @transform_4(%arg0: i32, %arg1: i32) -> (i32, i32) {
    %c0_i32 = arith.constant 0 : i32
    %c0_i32_0 = arith.constant 0 : i32
    %c0_i32_1 = arith.constant 0 : i32
    return %c0_i32, %c0_i32_0 : i32, i32
  }
  func.func @transform_5(%arg0: i32, %arg1: i32) -> (i32, i32, i32, i32) {
    %c0_i32 = arith.constant 0 : i32
    %c0_i32_0 = arith.constant 0 : i32
    %c0_i32_1 = arith.constant 0 : i32
    return %arg0, %arg1, %c0_i32, %c0_i32_0 : i32, i32, i32, i32
  }
}

</mosaic_0001>

<bundles_post_ra>
// kernel: tpu_custom_call.1
= control target key start
LH: loop header
LB: loop body
LE: loop exit
PB: predicated region body
PF: predicated region fallthrough
CT: control target
= control target key end

     0   :  { %s3140_s18 = smov 0   ;;  %s3142_s19 = smov 0   ;;  %s4668_s0 = inlined_call_operand.vmem [shape: bf16[2,18,18,18,8], index: 0, kind: input, shape index: {}]   ;;  %s4669_s1 = inlined_call_operand.vmem [shape: bf16[2,18,18,18,8], index: 1, kind: input, shape index: {}]   ;;  %s4670_s2 = inlined_call_operand.vmem [shape: bf16[2,18,18,18,8], index: 2, kind: input, shape index: {}]   ;;  %s4671_s3 = inlined_call_operand.vmem [shape: bf16[216,16], index: 3, kind: input, shape index: {}]   ;;  %s4672_s4 = inlined_call_operand.vmem [shape: f32[1,16], index: 4, kind: input, shape index: {}]   ;;  %s4673_s5 = inlined_call_operand.vmem [shape: bf16[2,8,64,16], index: 5, kind: output, shape index: {}]  }
   0x1   :  { %s3144_s20 = smov 0   ;;  %s3146_s21 = smov 0  }
   0x2   :  { %s3148_s22 = smov 0  }
   0x3 LB: > { %s24_s23 = sadd.s32 1, %s3085_s20  ;;  %s27_s24 = sadd.s32 1, %s3089_s21  ;;  %s3093_s22 = sphi %s3148_s22, %s15_s22   ;;  %s3089_s21 = sphi %s3146_s21, %s4755_s21   ;;  %s3085_s20 = sphi %s3144_s20, %s4754_s20   ;;  %s3081_s19 = sphi %s3142_s19, %s4753_s19   ;;  %s3077_s18 = sphi %s3140_s18, %s4752_s18  }
   0x4   : > { %p25_p0 = scmp.ge.s32.totalorder %s24_s23, 8  ;;  %p2838_p1 = scmp.ge.s32.totalorder %s3093_s22, 1 }
   0x5   : > { %p259_p2 = scmp.lt.s32.totalorder %s3093_s22, 17 }
   0x6   : > { %s4757_s23 = smov (%p25_p0, %s24_s23), 0  ;;  %s4759_s24 = smov (!%p25_p0, %s27_s24), %s3089_s21 }
   0x7   : > { %p260_p3 = pnand %p2838_p1, %p259_p2  ;;  %p29_p4 = scmp.ge.s32.totalorder %s4759_s24, 2 }
   0x9   : > { %s4761_s24 = smov (%p29_p4, %s4759_s24), 0  ;;  %263 = sbr.rel (%p260_p3) target bundleno = 586 (0x24a), region = 40 }
   0xe   : > { %s3173_s25 = sshll.u32 %s3077_s18, 1  ;;  %p319_p5 = scmp.lt.s32.totalorder %s3081_s19, 1  ;;  %vm416_vm0 = vsmask.f32 3328  ;;  %vm417_vm1 = vsmask.f32 7440 }
   0xf   : > { %p321_p6 = scmp.lt.s32.totalorder %s3173_s25, 17  ;;  %s330_s26 = sadd.s32 1, %s3173_s25  ;;  %vm3219_vm2 = vmor %vm416_vm0, %vm417_vm1  ;;  %vm2063_vm3 = vcmask 64512   ;;  %vm2076_vm4 = vcmask 130048   ;;  %vm2085_vm5 = vcmask 195584   ;;  %vm2094_vm6 = vcmask 261120  }
  0x10   : > { %s4763_s19 = smov (!%p319_p5, %s3081_s19), 1  ;;  %p333_p7 = scmp.lt.s32.totalorder %s330_s26, 17  ;;  %vm2103_vm7 = vcmask 326656   ;;  %vm2112_vm8 = vcmask 392192   ;;  %vm2604_vm9 = vcmask 1043456   ;;  %vm2121_vm10 = vcmask 457728  }
  0x11   : > { %s322_s27 = scalar_select %p321_p6, %s3173_s25, 17  ;;  %vm2130_vm11 = vcmask 523264   ;;  %vm2139_vm12 = vcmask 588800   ;;  %vm2148_vm13 = vcmask 654336   ;;  %vm2157_vm14 = vcmask 719872  }
  0x12   : > { %s3181_s28 = smul.u32 972, %s4763_s19  ;;  %s4765_s26 = smov (!%p333_p7, %s330_s26), 17  ;;  %vm2166_vm15 = vcmask 785408   ;;  %vm2175_vm0 = vcmask 850944   ;;  %vm2184_vm1 = vcmask 916480  }
  0x13   : > { %s2993_s29 = smul.u32 54, %s322_s27  ;;  %s3095_s12 = smov 24  }
  0x14   : > { %s2995_s7 = smul.u32 54, %s4765_s26  ;;  %s343_s13 = sadd.s32 2, %s3173_s25 }
  0x15   : > { %s325_s30 = sadd.s32 %s3181_s28, %s2993_s29  ;;  %p3248_p8 = scmp.lt.s32.totalorder %s343_s13, 17 }
  0x16   : > { %s2840_s6 = sshll.u32 %s325_s30, 2  ;;  %s3190_s11 = sadd.s32 %s2995_s7, %s3181_s28 }
  0x17   : > { %s3187_s10 = scalar_lea.vmem %s4668_s0, %s2840_s6  ;;  %s4767_s13 = smov (!%p3248_p8, %s343_s13), 17 }
  0x18   : > { %v2850_v0 = vld [vmem:[%s3187_s10 + $0x6c] sm:$0xf]  ;;  %v2954_v1 = vld [vmem:[%s3187_s10 + $0x74] sm:$0xf0]  ;;  %v2858_v2 = vld [vmem:[%s3187_s10 + $0x9c] sm:$0xf] }
  0x19   : > { %v2851_v3 = vor.u32 %v2954_v1, %v2850_v0  ;;  %v2956_v4 = vld [vmem:[%s3187_s10 + $0xa4] sm:$0xf0]  ;;  %v2854_v5 = vld [vmem:[%s3187_s10 + $0x84] sm:$0xf]  ;;  %v2955_v7 = vld [vmem:[%s3187_s10 + $0x8c] sm:$0xf0] }
  0x1a   : > { %v2859_v6 = vor.u32 %v2956_v4, %v2858_v2  ;;  %v2862_v8 = vld [vmem:[%s3187_s10 + $0xb4] sm:$0xf]  ;;  %v2957_v9 = vld [vmem:[%s3187_s10 + $0xbc] sm:$0xf0]  ;;  %v2855_v10 = vor.u32 %v2955_v7, %v2854_v5  ;;  %v379_v12 = vld [vmem:[%s3187_s10 + $0x38] sm:$0x1] }
  0x1b   : > { %1825 = vrot.lane.b32.xlu2 %v2851_v3, %s3095_s12  ;;  %v378_v11 = vld [vmem:[%s3187_s10 + $0x34] sm:$0xf]  ;;  %v381_v13 = vld [vmem:[%s3187_s10 + $0x40] sm:$0xf]  ;;  %v382_v14 = vld [vmem:[%s3187_s10 + $0x44] sm:$0x1]  ;;  %v2863_v19 = vor.u32 %v2957_v9, %v2862_v8 }
  0x1c   : > { %1829 = vrot.lane.b32.xlu1 %v2859_v6, %s3095_s12  ;;  %v476_v15 = vshrl.u32 %v378_v11, 16  ;;  %v479_v16 = vshll.u32 %v378_v11, 16  ;;  %v485_v17 = vshll.u32 %v379_v12, 16  ;;  %v490_v18 = vshrl.u32 %v381_v13, 16  ;;  %1827 = vrot.lane.b32.xlu0 %v2855_v10, %s3095_s12  ;;  %v366_v22 = vld [vmem:[%s3187_s10 + $0x4] sm:$0xf] }
  0x1d   : > { %v493_v20 = vshll.u32 %v381_v13, 16  ;;  %v499_v21 = vshll.u32 %v382_v14, 16  ;;  %v367_v23 = vld [vmem:[%s3187_s10 + $0x8] sm:$0x1]  ;;  %v369_v28 = vld [vmem:[%s3187_s10 + $0x10] sm:$0xf] }
  0x1e   : > { %v478_v24 = vrot.slane %v476_v15, 4  ;;  %v3209_v25 = vrot.slane %v479_v16, 5  ;;  %v487_v26 = vrot.slane %v485_v17, 5  ;;  %v492_v27 = vrot.slane %v490_v18, 4  ;;  %v370_v31 = vld [vmem:[%s3187_s10 + $0x14] sm:$0x1] }
  0x1f   : > { %v3212_v29 = vrot.slane %v493_v20, 5  ;;  %v501_v30 = vrot.slane %v499_v21, 5  ;;  %v420_v32 = vshrl.u32 %v366_v22, 16  ;;  %v423_v33 = vshll.u32 %v366_v22, 16  ;;  %v365_v38 = vld [vmem:[%s3187_s10] sm:$0xf] }
  0x20   : > { %v482_v34 = vor.u32 %v3209_v25, %v478_v24  ;;  %v429_v35 = vshll.u32 %v367_v23, 16  ;;  %v434_v36 = vshrl.u32 %v369_v28, 16  ;;  %v437_v37 = vshll.u32 %v369_v28, 16  ;;  %v3227_v44 = vld [vmem:[%s3187_s10 + $0xc] sm:$0xf]  ;;  %s3096_s15 = smov 8  }
  0x21   : > { %v496_v40 = vor.u32 %v3212_v29, %v492_v27  ;;  %v422_v41 = vrot.slane %v420_v32, 4  ;;  %v3224_v42 = vrot.slane %v423_v33, 5  ;;  %v443_v43 = vshll.u32 %v370_v31, 16  ;;  %v384_v57 = vld [vmem:[%s3187_s10 + $0x4c] sm:$0xf]  ;;  %s2996_s16 = smul.u32 54, %s4767_s13 }
  0x22   : > { %v483_v45 = vrot.slane %v482_v34, 4  ;;  %v431_v46 = vrot.slane %v429_v35, 5  ;;  %v436_v47 = vrot.slane %v434_v36, 4  ;;  %v3229_v48 = vrot.slane %v437_v37, 5  ;;  %v385_v2 = vld [vmem:[%s3187_s10 + $0x50] sm:$0x1] }
  0x23   : > { %1831 = vrot.lane.b32.xlu2 %v2863_v19, %s3095_s12  ;;  %v497_v49 = vrot.slane %v496_v40, 4  ;;  %v426_v50 = vor.u32 %v3224_v42, %v422_v41  ;;  %v445_v51 = vrot.slane %v443_v43, 5  ;;  %v532_v52 = vshrl.u32 %v365_v38, 16  ;;  %v387_v5 = vld [vmem:[%s3187_s10 + $0x58] sm:$0xf]  ;;  %s3282_s17 = sadd.s32 %s2996_s16, %s3181_s28  ;;  %s3097_s25 = smov 16  }
  0x24   : > { %v488_v53 = vsel %vm3219_vm2, %v483_v45, %v487_v26  ;;  %v440_v54 = vor.u32 %v3229_v48, %v436_v47  ;;  %v535_v55 = vshll.u32 %v365_v38, 16  ;;  %v542_v56 = vshrl.u32 %v3227_v44, 16  ;;  %v388_v12 = vld [vmem:[%s3187_s10 + $0x5c] sm:$0x1]  ;;  %v373_v27 = vld [vmem:[%s3187_s10 + $0x20] sm:$0x1] }
  0x25   : > { %v502_v58 = vsel %vm3219_vm2, %v497_v49, %v501_v30  ;;  %v3241_v59 = vunpack.c.l.b16 %v488_v53  ;;  %v427_v60 = vrot.slane %v426_v50, 4  ;;  %v534_v61 = vrot.slane %v532_v52, 4  ;;  %v372_v26 = vld [vmem:[%s3187_s10 + $0x1c] sm:$0xf]  ;;  %v375_v33 = vld [vmem:[%s3187_s10 + $0x28] sm:$0xf] }
  0x26   : > { %v3243_v62 = vunpack.c.l.b16 %v502_v58  ;;  %v441_v63 = vrot.slane %v440_v54, 4  ;;  %v537_v0 = vrot.slane %v535_v55, 5  ;;  %v544_v1 = vrot.slane %v542_v56, 4  ;;  %v3292_v50 = vld [vmem:[%s3187_s10 + $0x18] sm:$0xf]  ;;  %s3098_s26 = smov 32  }
  0x27   : > { %4704 = vst [vmem:[#allocation2_spill] sm:$0xff] %v3241_v59  ;;  %v432_v3 = vsel %vm3219_vm2, %v427_v60, %v431_v46  ;;  %v545_v4 = vshll.u32 %v3227_v44, 16  ;;  %v504_v6 = vshrl.u32 %v384_v57, 16  ;;  %v507_v7 = vshll.u32 %v384_v57, 16  ;;  %v376_v46 = vld [vmem:[%s3187_s10 + $0x2c] sm:$0x1] }
  0x28   : > { %v1775_v8 = vpack.c.b16 %v3243_v62, %v3241_v59  ;;  %v446_v9 = vsel %vm3219_vm2, %v441_v63, %v445_v51  ;;  %v1765_v10 = vunpack.c.l.b16 %v432_v3  ;;  %v538_v11 = vor.u32 %v537_v0, %v534_v61  ;;  %s3099_s27 = smov 40   ;;  %s2844_s28 = sshll.u32 %s3282_s17, 2 }
  0x29   : > { %v3261_v13 = vunpack.c.l.b16 %v446_v9  ;;  %v547_v14 = vrot.slane %v545_v4, 5  ;;  %v506_v15 = vrot.slane %v504_v6, 4  ;;  %v3263_v16 = vrot.slane %v507_v7, 5  ;;  %s3100_s29 = smov 48   ;;  %s2842_s30 = sshll.u32 %s3190_s11, 2 }
  0x2a   : > { %1781 = vrot.lane.b32.xlu1 %v1775_v8, %s3096_s15  ;;  %v539_v17 = vrot.slane %v538_v11, 4  ;;  %v513_v18 = vshll.u32 %v385_v2, 16  ;;  %v518_v19 = vshrl.u32 %v387_v5, 16  ;;  %v521_v20 = vshll.u32 %v387_v5, 16  ;;  %v3309_v5 = vld [vmem:[%s3187_s10 + $0x48] sm:$0xf]  ;;  %s3484_s8 = scalar_lea.vmem %s4670_s2, %s2844_s28  ;;  %s3493_s13 = scalar_lea.vmem %s4669_s1, %s2842_s30 }
  0x2b   : > { %v1773_v21 = vpack.c.b16 %v3261_v13, %v1765_v10  ;;  %v548_v22 = vor.u32 %v547_v14, %v544_v1  ;;  %v510_v23 = vor.u32 %v3263_v16, %v506_v15  ;;  %v527_v24 = vshll.u32 %v388_v12, 16  ;;  %v3315_v10 = vld [vmem:[%s3187_s10 + $0x54] sm:$0xf]  ;;  %s3101_s14 = smov 56   ;;  %s3102_s16 = smov 64  }
  0x2c   : > { %v540_v28 = vsel %vm3219_vm2, %v539_v17, %v3224_v42  ;;  %v515_v30 = vrot.slane %v513_v18, 5  ;;  %v520_v31 = vrot.slane %v518_v19, 4  ;;  %v3277_v32 = vrot.slane %v521_v20, 5  ;;  %s3103_s17 = smov 72   ;;  %s3104_s28 = smov 80  }
  0x2d   : > { %1777 = vrot.lane.b32.xlu0 %v1773_v21, %s3096_s15  ;;  %v549_v34 = vrot.slane %v548_v22, 4  ;;  %v1785_v35 = vunpack.c.l.b16 %v540_v28  ;;  %v511_v36 = vrot.slane %v510_v23, 4  ;;  %v529_v37 = vrot.slane %v527_v24, 5  ;;  %s4698_s30 = smov 96   ;;  %s4699_s6 = smov 88  }
  0x2e   : > { %v524_v38 = vor.u32 %v3277_v32, %v520_v31  ;;  %v448_v40 = vshrl.u32 %v372_v26, 16  ;;  %v451_v41 = vshll.u32 %v372_v26, 16  ;;  %v457_v42 = vshll.u32 %v373_v27, 16  ;;  %v3328_v26 = vld [vmem:[%s3187_s10 + $0x30] sm:$0xf]  ;;  %s3107_s7 = smov 104  }
  0x2f   : > { %v550_v43 = vsel %vm3219_vm2, %v549_v34, %v3229_v48  ;;  %v516_v45 = vsel %vm3219_vm2, %v511_v36, %v515_v30  ;;  %v462_v47 = vshrl.u32 %v375_v33, 16  ;;  %v465_v49 = vshll.u32 %v375_v33, 16  ;;  %v3299_v48 = vld [vmem:[%s3187_s10 + $0x24] sm:$0xf]  ;;  %v3335_v33 = vld [vmem:[%s3187_s10 + $0x3c] sm:$0xf] }
  0x30   : > { %v3294_v51 = vunpack.c.l.b16 %v550_v43  ;;  %v525_v52 = vrot.slane %v524_v38, 4  ;;  %v3296_v53 = vunpack.c.l.b16 %v516_v45  ;;  %v450_v54 = vrot.slane %v448_v40, 4  ;;  %s3108_s9 = smov 112   ;;  %s4696_s11 = smov 120  }
  0x31   : > { %v453_v55 = vrot.slane %v451_v41, 5  ;;  %v459_v56 = vrot.slane %v457_v42, 5  ;;  %v464_v57 = vrot.slane %v462_v47, 4  ;;  %v467_v58 = vrot.slane %v465_v49, 5  ;;  %v405_v49 = vld [vmem:[%s3187_s10 + $0xa0] sm:$0xf] }
  0x32   : > { %v1793_v60 = vpack.c.b16 %v3294_v51, %v1785_v35  ;;  %v530_v61 = vsel %vm3219_vm2, %v525_v52, %v529_v37  ;;  %v471_v63 = vshll.u32 %v376_v46, 16  ;;  %v552_v0 = vshrl.u32 %v3292_v50, 16  ;;  %p357_p9 = scmp.lt.s32.totalorder %s3077_s18, 7 }
  0x33   : > { %v3305_v1 = vunpack.c.l.b16 %v530_v61  ;;  %v454_v2 = vor.u32 %v453_v55, %v450_v54  ;;  %v468_v3 = vor.u32 %v467_v58, %v464_v57  ;;  %v555_v4 = vshll.u32 %v3292_v50, 16 }
  0x34   : > { %1797 = vrot.lane.b32.xlu2 %v1793_v60, %s3097_s25  ;;  %v473_v6 = vrot.slane %v471_v63, 5  ;;  %v554_v7 = vrot.slane %v552_v0, 4  ;;  %v562_v8 = vshrl.u32 %v3299_v48, 16  ;;  %v565_v9 = vshll.u32 %v3299_v48, 16  ;;  %v406_v60 = vld [vmem:[%s3187_s10 + $0xa4] sm:$0x1] }
  0x35   : > { %v1776_v11 = vpack.c.b16 %v3305_v1, %v3296_v53  ;;  %v455_v12 = vrot.slane %v454_v2, 4  ;;  %v469_v14 = vrot.slane %v468_v3, 4  ;;  %v557_v15 = vrot.slane %v555_v4, 5  ;;  %v408_v4 = vld [vmem:[%s3187_s10 + $0xac] sm:$0xf]  ;;  %s4769_s18 = smov (!%p357_p9, %s3077_s18), 7 }
  0x36   : > { %v564_v17 = vrot.slane %v562_v8, 4  ;;  %v567_v18 = vrot.slane %v565_v9, 5  ;;  %v592_v19 = vshrl.u32 %v3309_v5, 16  ;;  %v595_v20 = vshll.u32 %v3309_v5, 16 }
  0x37   : > { %1783 = vrot.lane.b32.xlu1 %v1776_v11, %s3096_s15  ;;  %v460_v21 = vsel %vm3219_vm2, %v455_v12, %v459_v56  ;;  %v474_v22 = vsel %vm3219_vm2, %v469_v14, %v473_v6  ;;  %v558_v23 = vor.u32 %v557_v15, %v554_v7  ;;  %v602_v24 = vshrl.u32 %v3315_v10, 16 }
  0x38   : > { %v3330_v27 = vunpack.c.l.b16 %v460_v21  ;;  %v3332_v28 = vunpack.c.l.b16 %v474_v22  ;;  %v568_v30 = vor.u32 %v567_v18, %v564_v17  ;;  %v594_v31 = vrot.slane %v592_v19, 4  ;;  %v409_v17 = vld [vmem:[%s3187_s10 + $0xb0] sm:$0x1]  ;;  %v399_v22 = vld [vmem:[%s3187_s10 + $0x88] sm:$0xf] }
  0x39   : > { %v559_v34 = vrot.slane %v558_v23, 4  ;;  %v597_v35 = vrot.slane %v595_v20, 5  ;;  %v604_v36 = vrot.slane %v602_v24, 4  ;;  %v605_v37 = vshll.u32 %v3315_v10, 16 }
  0x3a   : > { %v1774_v38 = vpack.c.b16 %v3332_v28, %v3330_v27  ;;  %v569_v40 = vrot.slane %v568_v30, 4  ;;  %v572_v41 = vshrl.u32 %v3328_v26, 16  ;;  %v575_v42 = vshll.u32 %v3328_v26, 16 }
  0x3b   : > { %v560_v43 = vsel %vm3219_vm2, %v559_v34, %v453_v55  ;;  %v598_v45 = vor.u32 %v597_v35, %v594_v31  ;;  %v607_v46 = vrot.slane %v605_v37, 5  ;;  %v582_v47 = vshrl.u32 %v3335_v33, 16  ;;  %v400_v34 = vld [vmem:[%s3187_s10 + $0x8c] sm:$0x1] }
  0x3c   : > { %1779 = vrot.lane.b32.xlu0 %v1774_v38, %s3096_s15  ;;  %v570_v52 = vsel %vm3219_vm2, %v569_v40, %v467_v58  ;;  %v3349_v54 = vunpack.c.l.b16 %v560_v43  ;;  %v574_v56 = vrot.slane %v572_v41, 4  ;;  %v577_v57 = vrot.slane %v575_v42, 5  ;;  %v402_v38 = vld [vmem:[%s3187_s10 + $0x94] sm:$0xf] }
  0x3d   : > { %v3352_v61 = vunpack.c.l.b16 %v570_v52  ;;  %v599_v55 = vrot.slane %v598_v45, 4  ;;  %v608_v63 = vor.u32 %v607_v46, %v604_v36  ;;  %v584_v0 = vrot.slane %v582_v47, 4 }
  0x3e   : > { %v578_v2 = vor.u32 %v577_v57, %v574_v56  ;;  %v585_v3 = vshll.u32 %v3335_v33, 16  ;;  %v668_v6 = vshrl.u32 %v405_v49, 16  ;;  %v671_v7 = vshll.u32 %v405_v49, 16  ;;  %v403_v56 = vld [vmem:[%s3187_s10 + $0x98] sm:$0x1] }
  0x3f   : > { %4706 = vst [vmem:[#allocation3_spill] sm:$0xff] %v3352_v61  ;;  %v1794_v58 = vpack.c.b16 %v3352_v61, %v3349_v54  ;;  %v600_v8 = vsel %vm3219_vm2, %v599_v55, %v3263_v16  ;;  %v609_v9 = vrot.slane %v608_v63, 4  ;;  %v677_v11 = vshll.u32 %v406_v60, 16  ;;  %v393_v55 = vld [vmem:[%s3187_s10 + $0x70] sm:$0xf] }
  0x40   : > { %v3361_v12 = vunpack.c.l.b16 %v600_v8  ;;  %v579_v14 = vrot.slane %v578_v2, 4  ;;  %v587_v15 = vrot.slane %v585_v3, 5  ;;  %v670_v18 = vrot.slane %v668_v6, 4 }
  0x41   : > { %1799 = vrot.lane.b32.xlu2 %v1794_v58, %s3097_s25  ;;  %v610_v19 = vsel %vm3219_vm2, %v609_v9, %v3277_v32  ;;  %v3368_v20 = vrot.slane %v671_v7, 5  ;;  %v679_v21 = vrot.slane %v677_v11, 5  ;;  %v682_v16 = vshrl.u32 %v408_v4, 16 }
  0x42   : > { %v3371_v23 = vunpack.c.l.b16 %v610_v19  ;;  %v580_v24 = vsel %vm3219_vm2, %v579_v14, %v3209_v25  ;;  %v588_v30 = vor.u32 %v587_v15, %v584_v0  ;;  %v685_v31 = vshll.u32 %v408_v4, 16  ;;  %v394_v4 = vld [vmem:[%s3187_s10 + $0x74] sm:$0x1]  ;;  %v396_v14 = vld [vmem:[%s3187_s10 + $0x7c] sm:$0xf] }
  0x43   : > { %v3377_v35 = vunpack.c.l.b16 %v580_v24  ;;  %v674_v36 = vor.u32 %v3368_v20, %v670_v18  ;;  %v684_v32 = vrot.slane %v682_v16, 4  ;;  %v691_v37 = vshll.u32 %v409_v17, 16  ;;  %v397_v19 = vld [vmem:[%s3187_s10 + $0x80] sm:$0x1] }
  0x44   : > { %v1796_v40 = vpack.c.b16 %v3371_v23, %v3361_v12  ;;  %v589_v41 = vrot.slane %v588_v30, 4  ;;  %v3383_v42 = vrot.slane %v685_v31, 5  ;;  %v640_v43 = vshrl.u32 %v399_v22, 16 }
  0x45   : > { %4707 = vst [vmem:[#allocation4_spill] sm:$0xff] %v3377_v35  ;;  %v675_v25 = vrot.slane %v674_v36, 4  ;;  %v693_v45 = vrot.slane %v691_v37, 5  ;;  %v643_v46 = vshll.u32 %v399_v22, 16  ;;  %v649_v47 = vshll.u32 %v400_v34, 16 }
  0x46   : > { %1803 = vrot.lane.b32.xlu1 %v1796_v40, %s3097_s25  ;;  %v590_v49 = vsel %vm3219_vm2, %v589_v41, %v3212_v29  ;;  %v688_v52 = vor.u32 %v3383_v42, %v684_v32  ;;  %v642_v57 = vrot.slane %v640_v43, 4  ;;  %v654_v60 = vshrl.u32 %v402_v38, 16 }
  0x47   : > { %v3392_v63 = vunpack.c.l.b16 %v590_v49  ;;  %v680_v0 = vsel %vm3219_vm2, %v675_v25, %v679_v21  ;;  %v3396_v2 = vrot.slane %v643_v46, 5  ;;  %v651_v3 = vrot.slane %v649_v47, 5 }
  0x48   : > { %v689_v6 = vrot.slane %v688_v52, 4  ;;  %v1837_v7 = vunpack.c.l.b16 %v680_v0  ;;  %v656_v29 = vrot.slane %v654_v60, 4  ;;  %v657_v58 = vshll.u32 %v402_v38, 16  ;;  %v398_v38 = vld [vmem:[%s3187_s10 + $0x84] sm:$0xf] }
  0x49   : > { %v1795_v8 = vpack.c.b16 %v3392_v63, %v3377_v35  ;;  %v646_v9 = vor.u32 %v3396_v2, %v642_v57  ;;  %v663_v11 = vshll.u32 %v403_v56, 16  ;;  %v612_v15 = vshrl.u32 %v393_v55, 16  ;;  %v392_v0 = vld [vmem:[%s3187_s10 + $0x6c] sm:$0xf] }
  0x4a   : > { %v694_v17 = vsel %vm3219_vm2, %v689_v6, %v693_v45  ;;  %v3405_v18 = vrot.slane %v657_v58, 5  ;;  %v615_v21 = vshll.u32 %v393_v55, 16  ;;  %v621_v16 = vshll.u32 %v394_v4, 16  ;;  %v401_v45 = vld [vmem:[%s3187_s10 + $0x90] sm:$0xf] }
  0x4b   : > { %1801 = vrot.lane.b32.xlu0 %v1795_v8, %s3097_s25  ;;  %v1838_v22 = vunpack.c.l.b16 %v694_v17  ;;  %v647_v24 = vrot.slane %v646_v9, 4  ;;  %v665_v30 = vrot.slane %v663_v11, 5  ;;  %v614_v31 = vrot.slane %v612_v15, 4  ;;  %v395_v11 = vld [vmem:[%s3187_s10 + $0x78] sm:$0xf] }
  0x4c   : > { %v660_v34 = vor.u32 %v3405_v18, %v656_v29  ;;  %v3410_v36 = vrot.slane %v615_v21, 5  ;;  %v623_v32 = vrot.slane %v621_v16, 5  ;;  %v626_v37 = vshrl.u32 %v396_v14, 16  ;;  %v411_v21 = vld [vmem:[%s3187_s10 + $0xb8] sm:$0xf] }
  0x4d   : > { %v1843_v40 = vpack.c.b16 %v1838_v22, %v1837_v7  ;;  %v652_v41 = vsel %vm3219_vm2, %v647_v24, %v651_v3  ;;  %v629_v43 = vshll.u32 %v396_v14, 16  ;;  %v635_v25 = vshll.u32 %v397_v19, 16 }
  0x4e   : > { %v661_v46 = vrot.slane %v660_v34, 4  ;;  %v1835_v47 = vunpack.c.l.b16 %v652_v41  ;;  %v618_v49 = vor.u32 %v3410_v36, %v614_v31  ;;  %v628_v52 = vrot.slane %v626_v37, 4 }
  0x4f   : > { %1849 = vrot.lane.b32.xlu2 %v1843_v40, %s3098_s26  ;;  %v3418_v56 = vrot.slane %v629_v43, 5  ;;  %v637_v57 = vrot.slane %v635_v25, 5  ;;  %v744_v60 = vshrl.u32 %v398_v38, 16  ;;  %v747_v55 = vshll.u32 %v398_v38, 16  ;;  %v414_v43 = vld [vmem:[%s3187_s10 + $0xc4] sm:$0xf] }
  0x50   : > { %v666_v3 = vsel %vm3219_vm2, %v661_v46, %v665_v30  ;;  %v619_v4 = vrot.slane %v618_v49, 4  ;;  %v754_v6 = vshrl.u32 %v401_v45, 16  ;;  %v757_v7 = vshll.u32 %v401_v45, 16 }
  0x51   : > { %v1836_v29 = vunpack.c.l.b16 %v666_v3  ;;  %v632_v58 = vor.u32 %v3418_v56, %v628_v52  ;;  %v746_v8 = vrot.slane %v744_v60, 4  ;;  %v749_v9 = vrot.slane %v747_v55, 5  ;;  %v412_v52 = vld [vmem:[%s3187_s10 + $0xbc] sm:$0x1] }
  0x52   : > { %v624_v14 = vsel %vm3219_vm2, %v619_v4, %v623_v32  ;;  %v756_v15 = vrot.slane %v754_v6, 4  ;;  %v759_v17 = vrot.slane %v757_v7, 5  ;;  %v724_v19 = vshrl.u32 %v392_v0, 16 }
  0x53   : > { %v1842_v16 = vpack.c.b16 %v1836_v29, %v1835_v47  ;;  %v633_v22 = vrot.slane %v632_v58, 4  ;;  %v1833_v24 = vunpack.c.l.b16 %v624_v14  ;;  %v750_v30 = vor.u32 %v749_v9, %v746_v8 }
  0x54   : > { %v760_v31 = vor.u32 %v759_v17, %v756_v15  ;;  %v726_v34 = vrot.slane %v724_v19, 4  ;;  %v727_v37 = vshll.u32 %v392_v0, 16  ;;  %v734_v38 = vshrl.u32 %v395_v11, 16  ;;  %v415_v0 = vld [vmem:[%s3187_s10 + $0xc8] sm:$0x1] }
  0x55   : > { %1847 = vrot.lane.b32.xlu1 %v1842_v16, %s3098_s26  ;;  %v638_v32 = vsel %vm3219_vm2, %v633_v22, %v637_v57  ;;  %v751_v40 = vrot.slane %v750_v30, 4  ;;  %v737_v41 = vshll.u32 %v395_v11, 16  ;;  %v696_v25 = vshrl.u32 %v411_v21, 16  ;;  %v410_v22 = vld [vmem:[%s3187_s10 + $0xb4] sm:$0xf] }
  0x56   : > { %v1834_v45 = vunpack.c.l.b16 %v638_v32  ;;  %v761_v46 = vrot.slane %v760_v31, 4  ;;  %v729_v47 = vrot.slane %v727_v37, 5  ;;  %v736_v49 = vrot.slane %v734_v38, 4  ;;  %v413_v37 = vld [vmem:[%s3187_s10 + $0xc0] sm:$0xf] }
  0x57   : > { %v752_v60 = vsel %vm3219_vm2, %v751_v40, %v3396_v2  ;;  %v739_v55 = vrot.slane %v737_v41, 5  ;;  %v698_v3 = vrot.slane %v696_v25, 4  ;;  %v699_v4 = vshll.u32 %v411_v21, 16 }
  0x58   : > { %v1841_v6 = vpack.c.b16 %v1834_v45, %v1833_v24  ;;  %v762_v57 = vsel %vm3219_vm2, %v761_v46, %v3405_v18  ;;  %v1855_v7 = vunpack.c.l.b16 %v752_v60  ;;  %v730_v29 = vor.u32 %v729_v47, %v726_v34  ;;  %v404_v46 = vld [vmem:[%s3187_s10 + $0x9c] sm:$0xf] }
  0x59   : > { %v1856_v58 = vunpack.c.l.b16 %v762_v57  ;;  %v740_v8 = vor.u32 %v739_v55, %v736_v49  ;;  %v3440_v9 = vrot.slane %v699_v4, 5  ;;  %v705_v11 = vshll.u32 %v412_v52, 16  ;;  %v407_v55 = vld [vmem:[%s3187_s10 + $0xa8] sm:$0xf] }
  0x5a   : > { %1845 = vrot.lane.b32.xlu0 %v1841_v6, %s3098_s26  ;;  %v731_v2 = vrot.slane %v730_v29, 4  ;;  %v710_v14 = vshrl.u32 %v414_v43, 16  ;;  %v713_v15 = vshll.u32 %v414_v43, 16  ;;  %v719_v17 = vshll.u32 %v415_v0, 16 }
  0x5b   : > { %v1862_v19 = vpack.c.b16 %v1856_v58, %v1855_v7  ;;  %v741_v21 = vrot.slane %v740_v8, 4  ;;  %v702_v16 = vor.u32 %v3440_v9, %v698_v3  ;;  %v707_v18 = vrot.slane %v705_v11, 5 }
  0x5c   : > { %v732_v24 = vsel %vm3219_vm2, %v731_v2, %v3410_v36  ;;  %v712_v30 = vrot.slane %v710_v14, 4  ;;  %v715_v31 = vrot.slane %v713_v15, 5  ;;  %v721_v34 = vrot.slane %v719_v17, 5 }
  0x5d   : > { %1867 = vrot.lane.b32.xlu2 %v1862_v19, %s3099_s27  ;;  %v742_v38 = vsel %vm3219_vm2, %v741_v21, %v3418_v56  ;;  %v1853_v32 = vunpack.c.l.b16 %v732_v24  ;;  %v703_v40 = vrot.slane %v702_v16, 4  ;;  %v4679_v41 = vunpack.c.l.b16 %v3227_v44 }
  0x5e   : > { %v1854_v43 = vunpack.c.l.b16 %v742_v38  ;;  %v716_v25 = vor.u32 %v715_v31, %v712_v30  ;;  %v4676_v36 = vunpack.c.l.b16 %v3292_v50  ;;  %v784_v45 = vshrl.u32 %v410_v22, 16 }
  0x5f   : > { %v708_v47 = vsel %vm3219_vm2, %v703_v40, %v707_v18  ;;  %v787_v49 = vshll.u32 %v410_v22, 16  ;;  %v794_v52 = vshrl.u32 %v413_v37, 16  ;;  %v797_v60 = vshll.u32 %v413_v37, 16  ;;  %v3467_v22 = vld [vmem:[%s3187_s10 + $0x60] sm:$0xf] }
  0x60   : > { %v1861_v0 = vpack.c.b16 %v1854_v43, %v1853_v32  ;;  %v717_v3 = vrot.slane %v716_v25, 4  ;;  %v1839_v56 = vunpack.c.l.b16 %v708_v47  ;;  %v1875_v4 = vpack.c.b16 %v4676_v36, %v4679_v41  ;;  %v1297_v41 = vld [vmem:[%s3484_s8 + $0x2c] sm:$0x1] }
  0x61   : > { %v786_v6 = vrot.slane %v784_v45, 4  ;;  %v789_v57 = vrot.slane %v787_v49, 5  ;;  %v796_v7 = vrot.slane %v794_v52, 4  ;;  %v799_v29 = vrot.slane %v797_v60, 5 }
  0x62   : > { %1865 = vrot.lane.b32.xlu1 %v1861_v0, %s3099_s27  ;;  %v722_v58 = vsel %vm3219_vm2, %v717_v3, %v721_v34  ;;  %v764_v8 = vshrl.u32 %v404_v46, 16  ;;  %v767_v11 = vshll.u32 %v404_v46, 16  ;;  %v774_v2 = vshrl.u32 %v407_v55, 16 }
  0x63   : > { %v1840_v14 = vunpack.c.l.b16 %v722_v58  ;;  %v790_v15 = vor.u32 %v789_v57, %v786_v6  ;;  %v800_v17 = vor.u32 %v799_v29, %v796_v7  ;;  %v777_v19 = vshll.u32 %v407_v55, 16  ;;  %v3501_v6 = vld [vmem:[%s3484_s8 + $0x18] sm:$0xf]  ;;  %v3504_v57 = vld [vmem:[%s3484_s8 + $0x24] sm:$0xf] }
  0x64   : > { %v766_v21 = vrot.slane %v764_v8, 4  ;;  %v769_v16 = vrot.slane %v767_v11, 5  ;;  %v776_v18 = vrot.slane %v774_v2, 4  ;;  %v818_v32 = vshrl.u32 %v3467_v22, 16  ;;  %4708 = vst [vmem:[#allocation5_spill] sm:$0xff] %v3501_v6 }
  0x65   : > { %v1844_v24 = vpack.c.b16 %v1840_v14, %v1839_v56  ;;  %1879 = vrot.lane.b32.xlu2 %v1875_v4, %s3100_s29  ;;  %v791_v30 = vrot.slane %v790_v15, 4  ;;  %v801_v34 = vrot.slane %v800_v17, 4  ;;  %v779_v37 = vrot.slane %v777_v19, 5  ;;  %v836_v14 = vld [vmem:[%s3493_s13 + $0x24] sm:$0xf] }
  0x66   : > { %v770_v38 = vor.u32 %v769_v16, %v766_v21  ;;  %v4677_v40 = vunpack.c.l.b16 %v3315_v10  ;;  %v1874_v46 = vunpack.c.l.b16 %v3467_v22  ;;  %v4680_v55 = vunpack.c.l.b16 %v3335_v33  ;;  %v837_v15 = vld [vmem:[%s3493_s13 + $0x28] sm:$0xf] }
  0x67   : > { %1851 = vrot.lane.b32.xlu0 %v1844_v24, %s3098_s26  ;;  %v792_v43 = vsel %vm3219_vm2, %v791_v30, %v3440_v9  ;;  %v802_v25 = vsel %vm3219_vm2, %v801_v34, %v715_v31  ;;  %v780_v45 = vor.u32 %v779_v37, %v776_v18  ;;  %v4678_v31 = vunpack.c.l.b16 %v3309_v5  ;;  %v3530_v18 = vld [vmem:[%s3493_s13 + $0x30] sm:$0xf]  ;;  %v3533_v24 = vld [vmem:[%s3493_s13 + $0x34] sm:$0xf] }
  0x68   : > { %v1859_v47 = vunpack.c.l.b16 %v792_v43  ;;  %v1860_v49 = vunpack.c.l.b16 %v802_v25  ;;  %v771_v52 = vrot.slane %v770_v38, 4  ;;  %v1878_v9 = vpack.c.b16 %v1874_v46, %v4677_v40  ;;  %4709 = vst [vmem:[#allocation6_spill] sm:$0xff] %v3530_v18 }
  0x69   : > { %v781_v60 = vrot.slane %v780_v45, 4  ;;  %v4675_v56 = vunpack.c.l.b16 %v3299_v48  ;;  %v4681_v4 = vunpack.c.l.b16 %v3328_v26  ;;  %v3509_v58 = vrot.slane %v818_v32, 4  ;;  %v3536_v32 = vld [vmem:[%s3484_s8 + $0x84] sm:$0xf] }
  0x6a   : > { %v1864_v0 = vpack.c.b16 %v1860_v49, %v1859_v47  ;;  %v772_v3 = vsel %vm3219_vm2, %v771_v52, %v3368_v20  ;;  %v1470_v8 = vshrl.u32 %v3501_v6, 16  ;;  %v1877_v11 = vpack.c.b16 %v4678_v31, %v4680_v55  ;;  %v3543_v47 = vld [vmem:[%s3484_s8 + $0x8c] sm:$0xf0] }
  0x6b   : > { %v782_v7 = vsel %vm3219_vm2, %v781_v60, %v3383_v42  ;;  %v1857_v29 = vunpack.c.l.b16 %v772_v3  ;;  %v1473_v2 = vshll.u32 %v3501_v6, 16  ;;  %v1480_v42 = vshrl.u32 %v3504_v57, 16 }
  0x6c   : > { %1871 = vrot.lane.b32.xlu1 %v1864_v0, %s3099_s27  ;;  %v1858_v20 = vunpack.c.l.b16 %v782_v7  ;;  %v1876_v17 = vpack.c.b16 %v4681_v4, %v4675_v56  ;;  %v1483_v19 = vshll.u32 %v3504_v57, 16  ;;  %v4674_v21 = vunpack.c.l.b16 %v3501_v6  ;;  %v1293_v0 = vld [vmem:[%s3484_s8 + $0x1c] sm:$0xf] }
  0x6d   : > { %1885 = vrot.lane.b32.xlu2 %v1878_v9, %s3100_s29  ;;  %v2235_v16 = vunpack.c.l.b16 %v3504_v57  ;;  %v1472_v34 = vrot.slane %v1470_v8, 4  ;;  %v1475_v37 = vrot.slane %v1473_v2, 5  ;;  %v921_v38 = vshrl.u32 %v837_v15, 16 }
  0x6e   : > { %v1863_v30 = vpack.c.b16 %v1858_v20, %v1857_v29  ;;  %v1482_v43 = vrot.slane %v1480_v42, 4  ;;  %v1485_v25 = vrot.slane %v1483_v19, 5  ;;  %v924_v46 = vshll.u32 %v837_v15, 16  ;;  %v1296_v20 = vld [vmem:[%s3484_s8 + $0x28] sm:$0xf] }
  0x6f   : > { %v2241_v45 = vpack.c.b16 %v2235_v16, %v4674_v21  ;;  %v3546_v49 = vrot.slane %v921_v38, 4  ;;  %v938_v52 = vshll.u32 %v3533_v24, 16  ;;  %v1021_v60 = vshrl.u32 %v836_v14, 16  ;;  %v1294_v21 = vld [vmem:[%s3484_s8 + $0x20] sm:$0x1] }
  0x70   : > { %1869 = vrot.lane.b32.xlu0 %v1863_v30, %s3099_s27  ;;  %v1024_v9 = vshll.u32 %v836_v14, 16  ;;  %v3550_v3 = vrot.slane %v924_v46, 5  ;;  %v1031_v7 = vshrl.u32 %v3530_v18, 16  ;;  %v1034_v29 = vshll.u32 %v3530_v18, 16 }
  0x71   : > { %v3557_v2 = vrot.slane %v938_v52, 5  ;;  %v1023_v42 = vrot.slane %v1021_v60, 4  ;;  %v2887_v19 = vor.u32 %v3543_v47, %v3536_v32  ;;  %v1366_v46 = vshrl.u32 %v1293_v0, 16 }
  0x72   : > { %v1026_v15 = vrot.slane %v1024_v9, 5  ;;  %v1033_v30 = vrot.slane %v1031_v7, 4  ;;  %v1036_v38 = vrot.slane %v1034_v29, 5  ;;  %v1369_v36 = vshll.u32 %v1293_v0, 16 }
  0x73   : > { %v1380_v40 = vshrl.u32 %v1296_v20, 16  ;;  %v1383_v52 = vshll.u32 %v1296_v20, 16  ;;  %v1476_v9 = vor.u32 %v1475_v37, %v1472_v34  ;;  %v1486_v31 = vor.u32 %v1485_v25, %v1482_v43  ;;  %v1320_v20 = vld [vmem:[%s3484_s8 + $0x88] sm:$0xf] }
  0x74   : > { %1883 = vrot.lane.b32.xlu1 %v1877_v11, %s3100_s29  ;;  %v1027_v56 = vor.u32 %v1026_v15, %v1023_v42  ;;  %v1037_v60 = vor.u32 %v1036_v38, %v1033_v30  ;;  %v1368_v32 = vrot.slane %v1366_v46, 4  ;;  %v1371_v55 = vrot.slane %v1369_v36, 5 }
  0x75   : > { %2246 = vrot.lane.b32.xlu2 %v2241_v45, %s3097_s25  ;;  %v1385_v7 = vrot.slane %v1383_v52, 5  ;;  %v1375_v29 = vshll.u32 %v1294_v21, 16  ;;  %v1477_v4 = vrot.slane %v1476_v9, 4  ;;  %v1487_v8 = vrot.slane %v1486_v31, 4  ;;  %v1319_v52 = vld [vmem:[%s3484_s8 + $0x84] sm:$0xf] }
  0x76   : > { %v1028_v47 = vrot.slane %v1027_v56, 4  ;;  %v1038_v14 = vrot.slane %v1037_v60, 4  ;;  %v1382_v11 = vrot.slane %v1380_v40, 4  ;;  %v1372_v34 = vor.u32 %v1371_v55, %v1368_v32 }
  0x77   : > { %v1377_v37 = vrot.slane %v1375_v29, 5  ;;  %v1389_v43 = vshll.u32 %v1297_v41, 16  ;;  %v1478_v31 = vsel %vm3219_vm2, %v1477_v4, %v1371_v55  ;;  %v1488_v40 = vsel %vm3219_vm2, %v1487_v8, %v1385_v7  ;;  %v1323_v4 = vld [vmem:[%s3484_s8 + $0x94] sm:$0xf] }
  0x78   : > { %1881 = vrot.lane.b32.xlu0 %v1876_v17, %s3100_s29  ;;  %v1029_v45 = vsel %vm3219_vm2, %v1028_v47, %v3550_v3  ;;  %v1039_v36 = vsel %vm3219_vm2, %v1038_v14, %v3557_v2  ;;  %v3581_v17 = vld [vmem:[%s3484_s8 + $0x30] sm:$0xf]  ;;  %v3585_v25 = vunpack.c.l.b16 %v1478_v31  ;;  %v3587_v41 = vunpack.c.l.b16 %v1488_v40  ;;  %v1321_v31 = vld [vmem:[%s3484_s8 + $0x8c] sm:$0x1] }
  0x79   : > { %v3574_v56 = vunpack.c.l.b16 %v1029_v45  ;;  %v3583_v21 = vunpack.c.l.b16 %v1039_v36  ;;  %v1373_v0 = vrot.slane %v1372_v34, 4  ;;  %v1386_v42 = vor.u32 %v1385_v7, %v1382_v11  ;;  %v1322_v7 = vld [vmem:[%s3484_s8 + $0x90] sm:$0xf] }
  0x7a   : > { %4711 = vst [vmem:[#allocation8_spill] sm:$0xff] %v3585_v25  ;;  %v1391_v15 = vrot.slane %v1389_v43, 5  ;;  %v1490_v14 = vshrl.u32 %v3581_v17, 16  ;;  %v1493_v55 = vshll.u32 %v3581_v17, 16  ;;  %v2281_v30 = vpack.c.b16 %v3587_v41, %v3585_v25 }
  0x7b   : > { %4710 = vst [vmem:[#allocation7_spill] sm:$0xff] %v3574_v56  ;;  %v2213_v8 = vpack.c.b16 %v3583_v21, %v3574_v56  ;;  %v1378_v38 = vsel %vm3219_vm2, %v1373_v0, %v1377_v37  ;;  %v4682_v46 = vunpack.c.l.b16 %v3581_v17  ;;  %v1387_v60 = vrot.slane %v1386_v42, 4  ;;  %v1324_v42 = vld [vmem:[%s3484_s8 + $0x98] sm:$0x1] }
  0x7c   : > { %v3602_v9 = vunpack.c.l.b16 %v1378_v38  ;;  %v3604_v32 = vrot.slane %v1490_v14, 4  ;;  %v1495_v47 = vrot.slane %v1493_v55, 5  ;;  %v1558_v11 = vshrl.u32 %v1320_v20, 16 }
  0x7d   : > { %2314 = vrot.lane.b32.xlu2 %v2887_v19, %s3099_s27  ;;  %2218 = vrot.lane.b32.xlu1 %v2213_v8, %s3096_s15  ;;  %v2363_v29 = vpack.c.b16 %v4682_v46, %v2235_v16  ;;  %v1561_v45 = vshll.u32 %v1320_v20, 16  ;;  %v1572_v34 = vshrl.u32 %v1323_v4, 16  ;;  %v1392_v19 = vsel %vm3219_vm2, %v1387_v60, %v1391_v15  ;;  %v1299_v8 = vld [vmem:[%s3484_s8 + $0x34] sm:$0xf] }
  0x7e   : > { %4712 = vst [vmem:[#allocation9_spill] sm:$0xff] %v3602_v9  ;;  %v1575_v37 = vshll.u32 %v1323_v4, 16  ;;  %v1662_v43 = vshrl.u32 %v1319_v52, 16  ;;  %v1665_v36 = vshll.u32 %v1319_v52, 16  ;;  %v4713_v57 = vpack.c.b16 %v3330_v27, %v3261_v13 }
  0x7f   : > { %v3619_v40 = vunpack.c.l.b16 %v1392_v19  ;;  %v1563_v16 = vrot.slane %v1561_v45, 5  ;;  %v1672_v0 = vshrl.u32 %v1322_v7, 16  ;;  %v1675_v20 = vshll.u32 %v1322_v7, 16 }
  0x80   : > { %1892 = vrot.lane.b32.xlu0 %v4713_v57, %s3101_s14  ;;  %v1577_v14 = vrot.slane %v1575_v37, 5  ;;  %v1664_v55 = vrot.slane %v1662_v43, 4  ;;  %v1667_v15 = vrot.slane %v1665_v36, 5  ;;  %v1560_v4 = vrot.slane %v1558_v11, 4  ;;  %v1300_v43 = vld [vmem:[%s3484_s8 + $0x38] sm:$0x1] }
  0x81   : > { %v2261_v38 = vpack.c.b16 %v3619_v40, %v3602_v9  ;;  %v1674_v52 = vrot.slane %v1672_v0, 4  ;;  %v1677_v60 = vrot.slane %v1675_v20, 5  ;;  %v1567_v46 = vshll.u32 %v1321_v31, 16  ;;  %v3629_v31 = vpop.permute.xlu2 %1825 }
  0x82   : > { %v1668_v13 = vor.u32 %v1667_v15, %v1664_v55  ;;  %v1564_v27 = vor.u32 %v1563_v16, %v1560_v4  ;;  %v1574_v19 = vrot.slane %v1572_v34, 4  ;;  %v1581_v57 = vshll.u32 %v1324_v42, 16  ;;  %v3638_v4 = vld [vmem:[%s3493_s13 + $0x3c] sm:$0xf] }
  0x83   : > { %v1678_v45 = vor.u32 %v1677_v60, %v1674_v52  ;;  %v1569_v25 = vrot.slane %v1567_v46, 5  ;;  %v1890_v7 = vpack.c.b16 %v3296_v53, %v3243_v62  ;;  %v1394_v37 = vshrl.u32 %v1299_v8, 16 }
  0x84   : > { %v1669_v11 = vrot.slane %v1668_v13, 4  ;;  %v1565_v36 = vrot.slane %v1564_v27, 4  ;;  %v1578_v0 = vor.u32 %v1577_v14, %v1574_v19  ;;  %v1583_v20 = vrot.slane %v1581_v57, 5  ;;  %v843_v57 = vld [vmem:[%s3493_s13 + $0x40] sm:$0xf] }
  0x85   : > { %2368 = vrot.lane.b32.xlu2 %v2363_v29, %s3102_s16  ;;  %2286 = vrot.lane.b32.xlu1 %v2281_v30, %s3098_s26  ;;  %v1679_v34 = vrot.slane %v1678_v45, 4  ;;  %v1397_v42 = vshll.u32 %v1299_v8, 16  ;;  %v1496_v46 = vor.u32 %v1495_v47, %v3604_v32  ;;  %v1396_v55 = vrot.slane %v1394_v37, 4 }
  0x86   : > { %v1670_v62 = vsel %vm3219_vm2, %v1669_v11, %v1563_v16  ;;  %v1570_v53 = vsel %vm3219_vm2, %v1565_v36, %v1569_v25  ;;  %v1579_v29 = vrot.slane %v1578_v0, 4  ;;  %v1403_v15 = vshll.u32 %v1300_v43, 16  ;;  %v3653_v11 = vld [vmem:[%s3493_s13 + $0x4c] sm:$0xf] }
  0x87   : > { %v1680_v30 = vsel %vm3219_vm2, %v1679_v34, %v1577_v14  ;;  %v2342_v8 = vunpack.c.l.b16 %v1670_v62  ;;  %v2322_v32 = vunpack.c.l.b16 %v1570_v53  ;;  %v1399_v47 = vrot.slane %v1397_v42, 5  ;;  %v3658_v42 = vld [vmem:[%s3493_s13 + $0x48] sm:$0xf] }
  0x88   : > { %2266 = vrot.lane.b32.xlu0 %v2261_v38, %s3095_s12  ;;  %v2343_v52 = vunpack.c.l.b16 %v1680_v30  ;;  %v1584_v16 = vsel %vm3219_vm2, %v1579_v29, %v1583_v20  ;;  %v1497_v60 = vrot.slane %v1496_v46, 4  ;;  %v1405_v25 = vrot.slane %v1403_v15, 5  ;;  %v1302_v29 = vld [vmem:[%s3484_s8 + $0x40] sm:$0xf]  ;;  %v3693_v46 = vld [vmem:[%s3484_s8 + $0x3c] sm:$0xf] }
  0x89   : > { %v2323_v13 = vunpack.c.l.b16 %v1584_v16  ;;  %v1400_v27 = vor.u32 %v1399_v47, %v1396_v55  ;;  %v1041_v19 = vshrl.u32 %v3638_v4, 16  ;;  %v1044_v38 = vshll.u32 %v3638_v4, 16 }
  0x8a   : > { %v2349_v14 = vpack.c.b16 %v2343_v52, %v2342_v8  ;;  %v1498_v45 = vsel %vm3219_vm2, %v1497_v60, %v1399_v47  ;;  %v4684_v37 = vunpack.c.l.b16 %v3530_v18  ;;  %v4685_v43 = vunpack.c.l.b16 %v3638_v4  ;;  %v1303_v60 = vld [vmem:[%s3484_s8 + $0x44] sm:$0x1] }
  0x8b   : > { %v2329_v36 = vpack.c.b16 %v2323_v13, %v2322_v32  ;;  %v3655_v0 = vunpack.c.l.b16 %v1498_v45  ;;  %v1401_v20 = vrot.slane %v1400_v27, 4  ;;  %v1043_v34 = vrot.slane %v1041_v19, 4 }
  0x8c   : > { %v935_v55 = vshrl.u32 %v3533_v24, 16  ;;  %v1046_v62 = vrot.slane %v1044_v38, 5  ;;  %v952_v53 = vshll.u32 %v843_v57, 16  ;;  %v1931_v30 = vpack.c.b16 %v4685_v43, %v4684_v37  ;;  %v841_v38 = vld [vmem:[%s3493_s13 + $0x38] sm:$0x1] }
  0x8d   : > { %1896 = vrot.lane.b32.xlu2 %v1890_v7, %s3101_s14  ;;  %2354 = vrot.lane.b32.xlu1 %v2349_v14, %s3101_s14  ;;  %v1406_v15 = vsel %vm3219_vm2, %v1401_v20, %v1405_v25  ;;  %v949_v8 = vshrl.u32 %v843_v57, 16  ;;  %v966_v32 = vshll.u32 %v3653_v11, 16  ;;  %v3674_v7 = vpop.permute.xlu2 %1831  ;;  %v1051_v16 = vshrl.u32 %v3658_v42, 16 }
  0x8e   : > { %v3672_v24 = vunpack.c.l.b16 %v1406_v15  ;;  %v954_v47 = vrot.slane %v952_v53, 5  ;;  %v1047_v52 = vor.u32 %v1046_v62, %v1043_v34  ;;  %v2389_v25 = vpack.c.b16 %v3655_v0, %v3587_v41 }
  0x8f   : > { %v3681_v13 = vrot.slane %v966_v32, 5  ;;  %v1054_v27 = vshll.u32 %v3658_v42, 16  ;;  %v1408_v19 = vshrl.u32 %v1302_v29, 16  ;;  %v1053_v45 = vrot.slane %v1051_v16, 4 }
  0x90   : > { %2334 = vrot.lane.b32.xlu0 %v2329_v36, %s3100_s29  ;;  %v2376_v57 = vpack.c.b16 %v3672_v24, %v3619_v40  ;;  %v1048_v14 = vrot.slane %v1047_v52, 4  ;;  %v1411_v20 = vshll.u32 %v1302_v29, 16  ;;  %v1417_v53 = vshll.u32 %v1303_v60, 16  ;;  %v844_v36 = vld [vmem:[%s3493_s13 + $0x44] sm:$0x1] }
  0x91   : > { %v1056_v34 = vrot.slane %v1054_v27, 5  ;;  %v1410_v62 = vrot.slane %v1408_v19, 4  ;;  %v937_v15 = vrot.slane %v935_v55, 4  ;;  %v944_v37 = vshll.u32 %v841_v38, 16 }
  0x92   : > { %v1049_v41 = vsel %vm3219_vm2, %v1048_v14, %v954_v47  ;;  %v3690_v32 = vrot.slane %v1411_v20, 5  ;;  %v951_v43 = vrot.slane %v949_v8, 4  ;;  %v1419_v40 = vrot.slane %v1417_v53, 5  ;;  %v3720_v53 = vld [vmem:[%s3493_s13 + $0x9c] sm:$0xf] }
  0x93   : > { %v1057_v9 = vor.u32 %v1056_v34, %v1053_v45  ;;  %v3695_v18 = vunpack.c.l.b16 %v1049_v41  ;;  %v941_v29 = vor.u32 %v3557_v2, %v937_v15  ;;  %v946_v52 = vrot.slane %v944_v37, 5  ;;  %v1326_v45 = vld [vmem:[%s3484_s8 + $0xa0] sm:$0xf]  ;;  %v1327_v15 = vld [vmem:[%s3484_s8 + $0xa4] sm:$0x1] }
  0x94   : > { %v1414_v55 = vor.u32 %v3690_v32, %v1410_v62  ;;  %v955_v16 = vor.u32 %v954_v47, %v951_v43  ;;  %v958_v60 = vshll.u32 %v844_v36, 16  ;;  %v1500_v19 = vshrl.u32 %v3693_v46, 16  ;;  %v3723_v36 = vld [vmem:[%s3493_s13 + $0xa4] sm:$0xf0] }
  0x95   : > { %1937 = vrot.lane.b32.xlu2 %v1931_v30, %s3103_s17  ;;  %2394 = vrot.lane.b32.xlu1 %v2389_v25, %s3104_s28  ;;  %v1058_v8 = vrot.slane %v1057_v9, 4  ;;  %v942_v27 = vrot.slane %v941_v29, 4  ;;  %v1503_v38 = vshll.u32 %v3693_v46, 16  ;;  %v4688_v37 = vunpack.c.l.b16 %v3693_v46  ;;  %v3715_v62 = vpop.permute.xlu2 %1797 }
  0x96   : > { %v1415_v2 = vrot.slane %v1414_v55, 4  ;;  %v956_v30 = vrot.slane %v955_v16, 4  ;;  %v960_v14 = vrot.slane %v958_v60, 5  ;;  %v1502_v47 = vrot.slane %v1500_v19, 4  ;;  %v1329_v16 = vld [vmem:[%s3484_s8 + $0xac] sm:$0xf] }
  0x97   : > { %v1059_v43 = vsel %vm3219_vm2, %v1058_v8, %v3681_v13  ;;  %v947_v9 = vsel %vm3219_vm2, %v942_v27, %v946_v52  ;;  %v1505_v25 = vrot.slane %v1503_v38, 5  ;;  %v1903_v41 = vpack.c.b16 %v3361_v12, %v3392_v63  ;;  %v3734_v52 = vpop.permute.xlu1 %1829  ;;  %v3745_v63 = vpop.permute.xlu0 %1827  ;;  %v1330_v19 = vld [vmem:[%s3484_s8 + $0xb0] sm:$0x1] }
  0x98   : > { %2381 = vrot.lane.b32.xlu0 %v2376_v57, %s3103_s17  ;;  %v3711_v20 = vunpack.c.l.b16 %v1059_v43  ;;  %v1420_v34 = vsel %vm3219_vm2, %v1415_v2, %v1419_v40  ;;  %v961_v57 = vsel %vm3219_vm2, %v956_v30, %v960_v14  ;;  %v3730_v55 = vunpack.c.l.b16 %v947_v9  ;;  %v867_v2 = vld [vmem:[%s3493_s13 + $0xa0] sm:$0xf] }
  0x99   : > { %v3728_v29 = vunpack.c.l.b16 %v1420_v34  ;;  %v3732_v40 = vunpack.c.l.b16 %v961_v57  ;;  %v4715_v8 = vunpack.c.l.b16 %v3581_v17  ;;  %v1506_v12 = vor.u32 %v1505_v25, %v1502_v47  ;;  %v870_v47 = vld [vmem:[%s3493_s13 + $0xac] sm:$0xf] }
  0x9a   : > { %v2214_v60 = vpack.c.b16 %v3711_v20, %v3695_v18  ;;  %v1586_v38 = vshrl.u32 %v1326_v45, 16  ;;  %v2875_v14 = vor.u32 %v3723_v36, %v3720_v53  ;;  %v1589_v43 = vshll.u32 %v1326_v45, 16 }
  0x9b   : > { %4714 = vst [vmem:[#allocation10_spill] sm:$0xff] %v3732_v40  ;;  %v3743_v27 = vpack.c.b16 %v4688_v37, %v4715_v8  ;;  %v2262_v30 = vpack.c.b16 %v3728_v29, %v3672_v24  ;;  %v1595_v9 = vshll.u32 %v1327_v15, 16  ;;  %v1507_v17 = vrot.slane %v1506_v12, 4  ;;  %v868_v24 = vld [vmem:[%s3493_s13 + $0xa4] sm:$0x1] }
  0x9c   : > { %v1588_v34 = vrot.slane %v1586_v38, 4  ;;  %v1600_v57 = vshrl.u32 %v1329_v16, 16  ;;  %v1603_v8 = vshll.u32 %v1329_v16, 16  ;;  %v3756_v25 = vrot.slane %v1589_v43, 5  ;;  %v871_v15 = vld [vmem:[%s3493_s13 + $0xb0] sm:$0x1] }
  0x9d   : > { %2220 = vrot.lane.b32.xlu1 %v2214_v60, %s3096_s15  ;;  %2268 = vrot.lane.b32.xlu2 %v2262_v30, %s3095_s12  ;;  %v1597_v37 = vrot.slane %v1595_v9, 5  ;;  %v1609_v6 = vshll.u32 %v1330_v19, 16  ;;  %v1127_v56 = vshrl.u32 %v867_v2, 16  ;;  %v1508_v45 = vsel %vm3219_vm2, %v1507_v17, %v3690_v32 }
  0x9e   : > { %v1602_v53 = vrot.slane %v1600_v57, 4  ;;  %v3762_v36 = vrot.slane %v1603_v8, 5  ;;  %v1130_v16 = vshll.u32 %v867_v2, 16  ;;  %v3766_v60 = vunpack.c.l.b16 %v1508_v45 }
  0x9f   : > { %v1592_v12 = vor.u32 %v3756_v25, %v1588_v34  ;;  %v1611_v38 = vrot.slane %v1609_v6, 5  ;;  %v1129_v30 = vrot.slane %v1127_v56, 4  ;;  %v1136_v9 = vshll.u32 %v868_v24, 16 }
  0xa0   : > { %1909 = vrot.lane.b32.xlu0 %v1903_v41, %s3102_s16  ;;  %v1606_v19 = vor.u32 %v3762_v36, %v1602_v53  ;;  %v3770_v43 = vrot.slane %v1130_v16, 5  ;;  %v1141_v32 = vshrl.u32 %v870_v47, 16  ;;  %v1951_v17 = vpack.c.b16 %v3732_v40, %v3730_v55  ;;  %v3774_v41 = vpop.permute.xlu2 %1799 }
  0xa1   : > { %v1593_v57 = vrot.slane %v1592_v12, 4  ;;  %v1144_v2 = vshll.u32 %v870_v47, 16  ;;  %v1150_v8 = vshll.u32 %v871_v15, 16  ;;  %v2282_v24 = vpack.c.b16 %v3766_v60, %v3655_v0  ;;  %v1782_v47 = vpop.permute.xlu1 %1781  ;;  %v1325_v15 = vld [vmem:[%s3484_s8 + $0x9c] sm:$0xf] }
  0xa2   : > { %v1607_v6 = vrot.slane %v1606_v19, 4  ;;  %v1133_v56 = vor.u32 %v3770_v43, %v1129_v30  ;;  %v1143_v45 = vrot.slane %v1141_v32, 4  ;;  %v1138_v16 = vrot.slane %v1136_v9, 5  ;;  %v1778_v32 = vpop.permute.xlu0 %1777 }
  0xa3   : > { %v1598_v53 = vsel %vm3219_vm2, %v1593_v57, %v1597_v37  ;;  %v3783_v12 = vrot.slane %v1144_v2, 5  ;;  %v1152_v30 = vrot.slane %v1150_v8, 5  ;;  %v4716_v9 = vunpack.c.l.b16 %v3328_v26 }
  0xa4   : > { %v1612_v34 = vsel %vm3219_vm2, %v1607_v6, %v1611_v38  ;;  %v2324_v19 = vunpack.c.l.b16 %v1598_v53  ;;  %v1134_v40 = vrot.slane %v1133_v56, 4  ;;  %v4717_v57 = vunpack.c.l.b16 %v3335_v33  ;;  %v1328_v38 = vld [vmem:[%s3484_s8 + $0xa8] sm:$0xf]  ;;  %v3053_v6 = vld [vmem:[%s3187_s10] sm:$0xf] }
  0xa5   : > { %1957 = vrot.lane.b32.xlu1 %v1951_v17, %s3104_s28  ;;  %2005 = vrot.lane.b32.xlu2 %v2875_v14, %s4698_s30  ;;  %v2325_v0 = vunpack.c.l.b16 %v1612_v34  ;;  %v1147_v37 = vor.u32 %v3783_v12, %v1143_v45  ;;  %v1753_v8 = vunpack.c.l.b16 %v3053_v6  ;;  %v1682_v56 = vshrl.u32 %v1325_v15, 16  ;;  %v866_v17 = vld [vmem:[%s3493_s13 + $0x9c] sm:$0xf] }
  0xa6   : > { %v1763_v2 = vpack.c.b16 %v4717_v57, %v4716_v9  ;;  %v1685_v53 = vshll.u32 %v1325_v15, 16  ;;  %v1139_v34 = vsel %vm3219_vm2, %v1134_v40, %v1138_v16  ;;  %v4718_v45 = vunpack.c.l.b16 %v3227_v44  ;;  %v3811_v40 = vld [vmem:[%s3484_s8 + $0x9c] sm:$0xf] }
  0xa7   : > { %v2330_v14 = vpack.c.b16 %v2325_v0, %v2324_v19  ;;  %v1148_v26 = vrot.slane %v1147_v37, 4  ;;  %v1684_v57 = vrot.slane %v1682_v56, 4  ;;  %v1692_v15 = vshrl.u32 %v1328_v38, 16 }
  0xa8   : > { %2248 = vrot.lane.b32.xlu0 %v3743_v27, %s3097_s25  ;;  %v3803_v33 = vsel %vm2063_vm3, %v1763_v2, %v1782_v47  ;;  %v1761_v9 = vpack.c.b16 %v4718_v45, %v1753_v8  ;;  %v1687_v6 = vrot.slane %v1685_v53, 5  ;;  %v1695_v61 = vshll.u32 %v1328_v38, 16  ;;  %v869_v27 = vld [vmem:[%s3493_s13 + $0xa8] sm:$0xf] }
  0xa9   : > { %v1153_v35 = vsel %vm3219_vm2, %v1148_v26, %v1152_v30  ;;  %v1223_v19 = vshrl.u32 %v866_v17, 16  ;;  %v1226_v0 = vshll.u32 %v866_v17, 16  ;;  %v2013_v59 = vunpack.c.l.b16 %v1139_v34  ;;  %v3815_v2 = vld [vmem:[%s3484_s8 + $0xa4] sm:$0xf0]  ;;  %v3821_v38 = vpop.permute.xlu2 %1849 }
  0xaa   : > { %v2066_v16 = vsel %vm2063_vm3, %v1761_v9, %v1778_v32  ;;  %v1688_v47 = vor.u32 %v1687_v6, %v1684_v57  ;;  %v1694_v37 = vrot.slane %v1692_v15, 4  ;;  %v1697_v8 = vrot.slane %v1695_v61, 5  ;;  %v1784_v57 = vpop.permute.xlu1 %1783 }
  0xab   : > { %v3819_v44 = vsel %vm2076_vm4, %v2066_v16, %v3715_v62  ;;  %v1225_v56 = vrot.slane %v1223_v19, 4  ;;  %v1228_v30 = vrot.slane %v1226_v0, 5  ;;  %v2014_v53 = vunpack.c.l.b16 %v1153_v35  ;;  %v3836_v19 = vld [vmem:[%s3484_s8 + $0x48] sm:$0xf] }
  0xac   : > { %v1689_v17 = vrot.slane %v1688_v47, 4  ;;  %v1233_v34 = vshrl.u32 %v869_v27, 16  ;;  %v1236_v26 = vshll.u32 %v869_v27, 16  ;;  %v4719_v32 = vshll.u32 %v3467_v22, 16 }
  0xad   : > { %2288 = vrot.lane.b32.xlu1 %v2282_v24, %s3098_s26  ;;  %2336 = vrot.lane.b32.xlu2 %v2330_v14, %s3100_s29  ;;  %v1698_v61 = vor.u32 %v1697_v8, %v1694_v37  ;;  %v1229_v62 = vor.u32 %v1228_v30, %v1225_v56  ;;  %v2891_v35 = vor.u32 %v3815_v2, %v3811_v40  ;;  %v4721_v40 = vunpack.c.l.b16 %v3309_v5 }
  0xae   : > { %v3825_v45 = vrot.slane %v4719_v32, 5  ;;  %v1690_v6 = vsel %vm3219_vm2, %v1689_v17, %v3756_v25  ;;  %v1235_v22 = vrot.slane %v1233_v34, 4  ;;  %v1238_v15 = vrot.slane %v1236_v26, 5  ;;  %v1780_v27 = vpop.permute.xlu0 %1779 }
  0xaf   : > { %v4720_v24 = vpack.c.b16 %v3695_v18, %v3583_v21  ;;  %v1699_v14 = vrot.slane %v1698_v61, 4  ;;  %v1230_v0 = vrot.slane %v1229_v62, 4  ;;  %v4722_v16 = vunpack.c.l.b16 %v3315_v10  ;;  %v3853_v18 = vld [vmem:[%s3493_s13] sm:$0xf] }
  0xb0   : > { %v4723_v25 = vunpack.c.l.b16 %v3292_v50  ;;  %v4724_v37 = vunpack.c.l.b16 %v3299_v48  ;;  %v2019_v8 = vpack.c.b16 %v2014_v53, %v2013_v59  ;;  %v2344_v56 = vunpack.c.l.b16 %v1690_v6  ;;  %v3864_v48 = vld [vmem:[%s3493_s13 + $0xc] sm:$0xf] }
  0xb1   : > { %1977 = vrot.lane.b32.xlu0 %v4720_v24, %s4699_s6  ;;  %v1764_v47 = vpack.c.b16 %v4722_v16, %v4721_v40  ;;  %v1239_v30 = vor.u32 %v1238_v15, %v1235_v22  ;;  %v1901_v17 = vpack.c.b16 %v3349_v54, %v3294_v51  ;;  %v1700_v5 = vsel %vm3219_vm2, %v1699_v14, %v3762_v36  ;;  %v828_v15 = vld [vmem:[%s3493_s13 + $0x4] sm:$0xf] }
  0xb2   : > { %v1762_v2 = vpack.c.b16 %v4724_v37, %v4723_v25  ;;  %v1231_v10 = vsel %vm3219_vm2, %v1230_v0, %v3770_v43  ;;  %v4695_v59 = vunpack.c.l.b16 %v3836_v19  ;;  %v2345_v21 = vunpack.c.l.b16 %v1700_v5 }
  0xb3   : > { %v1240_v53 = vrot.slane %v1239_v30, 4  ;;  %v1510_v26 = vshrl.u32 %v3836_v19, 16  ;;  %v2033_v36 = vunpack.c.l.b16 %v1231_v10  ;;  %v2075_v32 = vsel %vm2063_vm3, %v1764_v47, %v1784_v57  ;;  %v1306_v10 = vld [vmem:[%s3484_s8 + $0x50] sm:$0x1] }
  0xb4   : > { %v2069_v50 = vsel %vm2063_vm3, %v1762_v2, %v1780_v27  ;;  %v1513_v43 = vshll.u32 %v3836_v19, 16  ;;  %v991_v61 = vshrl.u32 %v3853_v18, 16  ;;  %v2350_v62 = vpack.c.b16 %v2345_v21, %v2344_v56  ;;  %v1305_v2 = vld [vmem:[%s3484_s8 + $0x4c] sm:$0xf] }
  0xb5   : > { %v3868_v34 = vsel %vm2076_vm4, %v2069_v50, %v3774_v41  ;;  %v1241_v6 = vsel %vm3219_vm2, %v1240_v53, %v3783_v12  ;;  %v994_v22 = vshll.u32 %v3853_v18, 16  ;;  %v1001_v41 = vshrl.u32 %v3864_v48, 16  ;;  %2025 = vrot.lane.b32.xlu1 %v2019_v8, %s3107_s7  ;;  %v831_v12 = vld [vmem:[%s3493_s13 + $0x10] sm:$0xf] }
  0xb6   : > { %v2034_v27 = vunpack.c.l.b16 %v1241_v6  ;;  %v4725_v57 = vunpack.c.l.b16 %v3693_v46  ;;  %v993_v14 = vrot.slane %v991_v61, 4  ;;  %v1004_v0 = vshll.u32 %v3864_v48, 16  ;;  %2356 = vrot.lane.b32.xlu2 %v2350_v62, %s3101_s14 }
  0xb7   : > { %v3888_v40 = vpop.permute.xlu2 %1867  ;;  %v996_v47 = vrot.slane %v994_v22, 5  ;;  %v1003_v25 = vrot.slane %v1001_v41, 4  ;;  %v879_v5 = vshrl.u32 %v828_v15, 16  ;;  %v882_v21 = vshll.u32 %v828_v15, 16  ;;  %v829_v41 = vld [vmem:[%s3493_s13 + $0x8] sm:$0x1] }
  0xb8   : > { %v2364_v24 = vpack.c.b16 %v4695_v59, %v4725_v57  ;;  %v2039_v46 = vpack.c.b16 %v2034_v27, %v2033_v36  ;;  %v1006_v8 = vrot.slane %v1004_v0, 5  ;;  %v1804_v30 = vpop.permute.xlu1 %1803  ;;  %v893_v53 = vshrl.u32 %v831_v12, 16  ;;  %v832_v15 = vld [vmem:[%s3493_s13 + $0x14] sm:$0x1] }
  0xb9   : > { %2316 = vrot.lane.b32.xlu0 %v2891_v35, %s3099_s27  ;;  %v3897_v50 = vsel %vm2076_vm4, %v2075_v32, %v1804_v30  ;;  %v896_v61 = vshll.u32 %v831_v12, 16  ;;  %v997_v62 = vor.u32 %v996_v47, %v993_v14  ;;  %v1422_v22 = vshrl.u32 %v1305_v2, 16 }
  0xba   : > { %v1007_v6 = vor.u32 %v1006_v8, %v1003_v25  ;;  %v884_v35 = vrot.slane %v882_v21, 5  ;;  %v1425_v36 = vshll.u32 %v1305_v2, 16  ;;  %v1431_v27 = vshll.u32 %v1306_v10, 16  ;;  %v855_v21 = vld [vmem:[%s3493_s13 + $0x70] sm:$0xf] }
  0xbb   : > { %v881_v57 = vrot.slane %v879_v5, 4  ;;  %v898_v0 = vrot.slane %v896_v61, 5  ;;  %v998_v59 = vrot.slane %v997_v62, 4  ;;  %v1424_v56 = vrot.slane %v1422_v22, 4  ;;  %v858_v62 = vld [vmem:[%s3493_s13 + $0x7c] sm:$0xf] }
  0xbc   : > { %v1008_v9 = vrot.slane %v1007_v6, 4  ;;  %v3900_v32 = vrot.slane %v1425_v36, 5  ;;  %v1433_v30 = vrot.slane %v1431_v27, 5  ;;  %v888_v12 = vshll.u32 %v829_v41, 16 }
  0xbd   : > { %v1802_v37 = vpop.permute.xlu0 %1801  ;;  %v885_v16 = vor.u32 %v884_v35, %v881_v57  ;;  %2045 = vrot.lane.b32.xlu1 %v2039_v46, %s3108_s9  ;;  %v999_v47 = vsel %vm3219_vm2, %v998_v59, %v884_v35  ;;  %v895_v2 = vrot.slane %v893_v53, 4  ;;  %v2089_v61 = vsel %vm2085_vm5, %v3868_v34, %v3745_v63  ;;  %v859_v35 = vld [vmem:[%s3493_s13 + $0x80] sm:$0x1] }
  0xbe   : > { %v2082_v14 = vsel %vm2076_vm4, %v3803_v33, %v1802_v37  ;;  %v1009_v25 = vsel %vm3219_vm2, %v1008_v9, %v898_v0  ;;  %2370 = vrot.lane.b32.xlu2 %v2364_v24, %s3102_s16  ;;  %v1961_v5 = vunpack.c.l.b16 %v999_v47  ;;  %v1428_v33 = vor.u32 %v3900_v32, %v1424_v56  ;;  %v856_v56 = vld [vmem:[%s3493_s13 + $0x74] sm:$0x1] }
  0xbf   : > { %v3911_v8 = vpop.permute.xlu2 %1879  ;;  %v3915_v46 = vsel %vm2085_vm5, %v2082_v14, %v3734_v52  ;;  %v3917_v10 = vunpack.c.l.b16 %v1009_v25  ;;  %v886_v9 = vrot.slane %v885_v16, 4  ;;  %v890_v59 = vrot.slane %v888_v12, 5 }
  0xc0   : > { %v899_v24 = vor.u32 %v898_v0, %v895_v2  ;;  %v902_v37 = vshll.u32 %v832_v15, 16  ;;  %v1512_v52 = vrot.slane %v1510_v26, 4  ;;  %v1429_v53 = vrot.slane %v1428_v33, 4  ;;  %v390_v2 = vld [vmem:[%s3187_s10 + $0x64] sm:$0xf] }
  0xc1   : > { %1905 = vrot.lane.b32.xlu0 %v1901_v17, %s3102_s16  ;;  %v1515_v51 = vrot.slane %v1513_v43, 5  ;;  %v4726_v54 = vunpack.c.l.b16 %v3638_v4  ;;  %v4727_v17 = vunpack.c.l.b16 %v3658_v42  ;;  %v1969_v41 = vpack.c.b16 %v3917_v10, %v1961_v5 }
  0xc2   : > { %v900_v6 = vrot.slane %v899_v24, 4  ;;  %v904_v22 = vrot.slane %v902_v37, 5  ;;  %v1434_v26 = vsel %vm3219_vm2, %v1429_v53, %v1433_v30  ;;  %v1071_v36 = vshrl.u32 %v855_v21, 16 }
  0xc3   : > { %v2053_v16 = vpack.c.b16 %v4727_v17, %v4726_v54  ;;  %v1074_v63 = vshll.u32 %v855_v21, 16  ;;  %v4728_v34 = vunpack.c.l.b16 %v3853_v18  ;;  %v4729_v43 = vunpack.c.l.b16 %v3864_v48  ;;  %v391_v21 = vld [vmem:[%s3187_s10 + $0x68] sm:$0x1]  ;;  %s4738_s10 = smov 120  }
  0xc4   : > { %v891_v4 = vsel %vm3219_vm2, %v886_v9, %v890_v59  ;;  %v1080_v57 = vshll.u32 %v856_v56, 16  ;;  %v1085_v0 = vshrl.u32 %v858_v62, 16  ;;  %v905_v15 = vsel %vm3219_vm2, %v900_v6, %v904_v22  ;;  %v3971_v6 = vld [vmem:[%s3493_s13 + $0x6c] sm:$0xf] }
  0xc5   : > { %v1929_v27 = vpack.c.b16 %v4729_v43, %v4728_v34  ;;  %v1073_v12 = vrot.slane %v1071_v36, 4  ;;  %v3950_v14 = vrot.slane %v1074_v63, 5  ;;  %v1088_v30 = vshll.u32 %v858_v62, 16  ;;  %2059 = vrot.lane.b32.xlu1 %v2053_v16, %s4696_s11 }
  0xc6   : > { %v3953_v18 = vunpack.c.l.b16 %v1434_v26  ;;  %v1087_v47 = vrot.slane %v1085_v0, 4  ;;  %v1094_v25 = vshll.u32 %v859_v35, 16  ;;  %1973 = vrot.lane.b32.xlu2 %v1969_v41, %s4699_s6  ;;  %v1941_v33 = vunpack.c.l.b16 %v891_v4  ;;  %v854_v0 = vld [vmem:[%s3493_s13 + $0x6c] sm:$0xf] }
  0xc7   : > { %v3957_v5 = vpop.permute.xlu2 %1885  ;;  %v1848_v9 = vpop.permute.xlu1 %1847  ;;  %v1077_v59 = vor.u32 %v3950_v14, %v1073_v12  ;;  %v1082_v24 = vrot.slane %v1080_v57, 5  ;;  %v3960_v37 = vrot.slane %v1088_v30, 5  ;;  %v3964_v53 = vunpack.c.l.b16 %v905_v15 }
  0xc8   : > { %v3967_v56 = vsel %vm2094_vm6, %v2089_v61, %v1848_v9  ;;  %v1096_v62 = vrot.slane %v1094_v25, 5  ;;  %v1516_v54 = vor.u32 %v1515_v51, %v1512_v52  ;;  %v3976_v22 = vsel %vm2085_vm5, %v3897_v50, %v3674_v7  ;;  %v2958_v61 = vld [vmem:[%s3493_s13 + $0x74] sm:$0xf0] }
  0xc9   : > { %1933 = vrot.lane.b32.xlu0 %v1929_v27, %s3103_s17  ;;  %v1078_v17 = vrot.slane %v1077_v59, 4  ;;  %v1091_v16 = vor.u32 %v3960_v37, %v1087_v47  ;;  %v804_v41 = vshrl.u32 %v390_v2, 16  ;;  %v2377_v26 = vpack.c.b16 %v3953_v18, %v3728_v29  ;;  %v3987_v50 = vld [vmem:[%s3493_s13 + $0x18] sm:$0xf] }
  0xca   : > { %v1517_v35 = vrot.slane %v1516_v54, 4  ;;  %v807_v36 = vshll.u32 %v390_v2, 16  ;;  %v813_v52 = vshll.u32 %v391_v21, 16  ;;  %v2087_v51 = vsel %vm2085_vm5, %v3819_v44, %v3629_v31  ;;  %v857_v31 = vld [vmem:[%s3493_s13 + $0x78] sm:$0xf] }
  0xcb   : > { %v1083_v63 = vsel %vm3219_vm2, %v1078_v17, %v1082_v24  ;;  %v1092_v34 = vrot.slane %v1091_v16, 4  ;;  %v806_v7 = vrot.slane %v804_v41, 4  ;;  %v1949_v43 = vpack.c.b16 %v3964_v53, %v1941_v33  ;;  %v4009_v21 = vld [vmem:[%s3493_s13 + $0x58] sm:$0xf] }
  0xcc   : > { %v1846_v27 = vpop.permute.xlu0 %1845  ;;  %v2009_v29 = vunpack.c.l.b16 %v1083_v63  ;;  %v1518_v4 = vsel %vm3219_vm2, %v1517_v35, %v3900_v32  ;;  %v3993_v57 = vrot.slane %v807_v36, 5  ;;  %v2867_v12 = vor.u32 %v2958_v61, %v3971_v6  ;;  %v4015_v6 = vld [vmem:[%s3493_s13 + $0x54] sm:$0xf]  ;;  %v852_v36 = vld [vmem:[%s3493_s13 + $0x64] sm:$0xf] }
  0xcd   : > { %v2096_v44 = vsel %vm2094_vm6, %v2087_v51, %v1846_v27  ;;  %v1097_v15 = vsel %vm3219_vm2, %v1092_v34, %v1096_v62  ;;  %v4001_v30 = vunpack.c.l.b16 %v1518_v4  ;;  %2383 = vrot.lane.b32.xlu1 %v2377_v26, %s3103_s17  ;;  %v815_v25 = vrot.slane %v813_v52, 5  ;;  %v4034_v4 = vld [vmem:[%s3493_s13 + $0x60] sm:$0xf] }
  0xce   : > { %v2010_v47 = vunpack.c.l.b16 %v1097_v15  ;;  %v810_v32 = vor.u32 %v3993_v57, %v806_v7  ;;  %v1923_v2 = vunpack.c.l.b16 %v3987_v50  ;;  %v1183_v9 = vshrl.u32 %v854_v0, 16 }
  0xcf   : > { %v4006_v33 = vpop.permute.xlu2 %2246  ;;  %v1186_v59 = vshll.u32 %v854_v0, 16  ;;  %v1193_v24 = vshrl.u32 %v857_v31, 16  ;;  %v2390_v54 = vpack.c.b16 %v4001_v30, %v3766_v60  ;;  %v1196_v16 = vshll.u32 %v857_v31, 16 }
  0xd0   : > { %v2017_v62 = vpack.c.b16 %v2010_v47, %v2009_v29  ;;  %v811_v17 = vrot.slane %v810_v32, 4  ;;  %v1185_v41 = vrot.slane %v1183_v9, 4  ;;  %v4020_v35 = vsel %vm2094_vm6, %v3915_v46, %v3821_v38 }
  0xd1   : > { %1953 = vrot.lane.b32.xlu0 %v1949_v43, %s3104_s28  ;;  %v1188_v26 = vrot.slane %v1186_v59, 5  ;;  %v1195_v61 = vrot.slane %v1193_v24, 4  ;;  %v4730_v60 = vunpack.c.l.b16 %v3864_v48  ;;  %v1198_v63 = vrot.slane %v1196_v16, 5 }
  0xd2   : > { %2021 = vrot.lane.b32.xlu2 %v2017_v62, %s3107_s7  ;;  %v816_v52 = vsel %vm3219_vm2, %v811_v17, %v815_v25  ;;  %v980_v34 = vshll.u32 %v4009_v21, 16  ;;  %v1061_v27 = vshrl.u32 %v4015_v6, 16  ;;  %v1064_v38 = vshll.u32 %v4015_v6, 16 }
  0xd3   : > { %v2051_v51 = vpack.c.b16 %v1923_v2, %v4730_v60  ;;  %v1887_v7 = vunpack.c.l.b16 %v816_v52  ;;  %v1189_v43 = vor.u32 %v1188_v26, %v1185_v41  ;;  %v1199_v29 = vor.u32 %v1198_v63, %v1195_v61 }
  0xd4   : > { %v1866_v46 = vpop.permute.xlu1 %1865  ;;  %v4036_v0 = vrot.slane %v980_v34, 5  ;;  %v1263_v31 = vshrl.u32 %v852_v36, 16  ;;  %v1266_v48 = vshll.u32 %v852_v36, 16  ;;  %v1063_v25 = vrot.slane %v1061_v27, 4 }
  0xd5   : > { %v4039_v15 = vsel %vm2103_vm7, %v2096_v44, %v1866_v46  ;;  %v1891_v47 = vpack.c.b16 %v1887_v7, %v3305_v1  ;;  %v1190_v32 = vrot.slane %v1189_v43, 4  ;;  %2001 = vrot.lane.b32.xlu1 %v2867_v12, %s4698_s30  ;;  %v1200_v9 = vrot.slane %v1199_v29, 4  ;;  %v847_v7 = vld [vmem:[%s3493_s13 + $0x50] sm:$0x1]  ;;  %v850_v46 = vld [vmem:[%s3493_s13 + $0x5c] sm:$0x1] }
  0xd6   : > { %v1066_v59 = vrot.slane %v1064_v38, 5  ;;  %v4043_v24 = vrot.slane %v1263_v31, 4  ;;  %v4045_v62 = vrot.slane %v1266_v48, 5  ;;  %v1277_v44 = vshrl.u32 %v4034_v4, 16  ;;  %v4085_v48 = vld [vmem:[%s3484_s8 + $0x54] sm:$0xf] }
  0xd7   : > { %v4047_v17 = vpop.permute.xlu2 %2314  ;;  %v1191_v16 = vsel %vm3219_vm2, %v1190_v32, %v3950_v14  ;;  %v1280_v1 = vshll.u32 %v4034_v4, 16  ;;  %v824_v41 = vor.u32 %v3825_v45, %v3509_v58  ;;  %v1201_v12 = vsel %vm3219_vm2, %v1200_v9, %v3960_v37 }
  0xd8   : > { %v2029_v26 = vunpack.c.l.b16 %v1191_v16  ;;  %v1067_v61 = vor.u32 %v1066_v59, %v1063_v25  ;;  %v2030_v52 = vunpack.c.l.b16 %v1201_v12  ;;  %v1279_v60 = vrot.slane %v1277_v44, 4 }
  0xd9   : > { %2396 = vrot.lane.b32.xlu0 %v2390_v54, %s3104_s28  ;;  %v1852_v14 = vpop.permute.xlu0 %1851  ;;  %v1282_v63 = vrot.slane %v1280_v1, 5  ;;  %v825_v34 = vrot.slane %v824_v41, 4  ;;  %v977_v45 = vshrl.u32 %v4009_v21, 16  ;;  %v4069_v54 = vsel %vm2103_vm7, %v3967_v56, %v3888_v40 }
  0xda   : > { %v2102_v58 = vsel %vm2094_vm6, %v3976_v22, %v1852_v14  ;;  %1898 = vrot.lane.b32.xlu2 %v1891_v47, %s3101_s14  ;;  %v1068_v37 = vrot.slane %v1067_v61, 4  ;;  %v1011_v43 = vshrl.u32 %v3987_v50, 16  ;;  %v1928_v22 = vunpack.c.l.b16 %v4015_v6  ;;  %v838_v61 = vld [vmem:[%s3493_s13 + $0x2c] sm:$0x1] }
  0xdb   : > { %v1283_v27 = vor.u32 %v1282_v63, %v1279_v60  ;;  %v826_v38 = vsel %vm3219_vm2, %v825_v34, %v3993_v57  ;;  %v1014_v29 = vshll.u32 %v3987_v50, 16  ;;  %v2037_v21 = vpack.c.b16 %v2030_v52, %v2029_v26 }
  0xdc   : > { %v1069_v31 = vsel %vm3219_vm2, %v1068_v37, %v4036_v0  ;;  %v4731_v40 = vshrl.u32 %v3653_v11, 16  ;;  %v1900_v57 = vunpack.c.l.b16 %v826_v38  ;;  %v972_v25 = vshll.u32 %v847_v7, 16 }
  0xdd   : > { %v1284_v47 = vrot.slane %v1283_v27, 4  ;;  %v4087_v32 = vunpack.c.l.b16 %v1069_v31  ;;  %2055 = vrot.lane.b32.xlu1 %v2051_v51, %s4696_s11  ;;  %v4732_v59 = vunpack.c.l.b16 %v3658_v42  ;;  %v979_v11 = vrot.slane %v977_v45, 4  ;;  %v1309_v45 = vld [vmem:[%s3484_s8 + $0x5c] sm:$0x1] }
  0xde   : > { %v965_v56 = vrot.slane %v4731_v40, 4  ;;  %v1872_v9 = vpop.permute.xlu1 %1871  ;;  %v986_v1 = vshll.u32 %v850_v46, 16  ;;  %v974_v26 = vrot.slane %v972_v25, 5  ;;  %v1520_v42 = vshrl.u32 %v4085_v48, 16 }
  0xdf   : > { %v1932_v16 = vpack.c.b16 %v1928_v22, %v4732_v59  ;;  %v4096_v41 = vsel %vm2103_vm7, %v2102_v58, %v1872_v9  ;;  %v4098_v12 = vpop.permute.xlu2 %2368  ;;  %v1285_v51 = vsel %vm3219_vm2, %v1284_v47, %v4045_v62  ;;  %v983_v52 = vor.u32 %v4036_v0, %v979_v11  ;;  %v1308_v58 = vld [vmem:[%s3484_s8 + $0x58] sm:$0xf]  ;;  %v2510_v0 = vld [vmem:[%s4671_s3 + $0x68] sm:$0xf] }
  0xe0   : > { %v969_v44 = vor.u32 %v3681_v13, %v965_v56  ;;  %v2211_v13 = vunpack.c.l.b16 %v1285_v51  ;;  %v988_v60 = vrot.slane %v986_v1, 5  ;;  %v1904_v63 = vpack.c.b16 %v1900_v57, %v3371_v23 }
  0xe1   : > { %2041 = vrot.lane.b32.xlu0 %v2037_v21, %s3108_s9  ;;  %v1523_v34 = vshll.u32 %v4085_v48, 16  ;;  %v984_v27 = vrot.slane %v983_v52, 4  ;;  %v1522_v38 = vrot.slane %v1520_v42, 4  ;;  %v930_v46 = vshll.u32 %v838_v61, 16  ;;  %v873_v52 = vld [vmem:[%s3493_s13 + $0xb8] sm:$0xf] }
  0xe2   : > { %v970_v14 = vrot.slane %v969_v44, 4  ;;  %v1870_v37 = vpop.permute.xlu0 %1869  ;;  %v2215_v7 = vpack.c.b16 %v2211_v13, %v4087_v32  ;;  %1939 = vrot.lane.b32.xlu2 %v1932_v16, %s3103_s17  ;;  %v4733_v40 = vor.u32 %v3550_v3, %v3546_v49  ;;  %v4128_v25 = vsel %vm2112_vm8, %v4039_v15, %v3911_v8 }
  0xe3   : > { %v2109_v23 = vsel %vm2103_vm7, %v4020_v35, %v1870_v37  ;;  %v1525_v31 = vrot.slane %v1523_v34, 5  ;;  %v989_v47 = vsel %vm3219_vm2, %v984_v27, %v988_v60  ;;  %v932_v57 = vrot.slane %v930_v46, 5  ;;  %v876_v37 = vld [vmem:[%s3493_s13 + $0xc4] sm:$0xf] }
  0xe4   : > { %v975_v21 = vsel %vm3219_vm2, %v970_v14, %v974_v26  ;;  %v928_v56 = vrot.slane %v4733_v40, 4  ;;  %v1436_v9 = vshrl.u32 %v1308_v58, 16  ;;  %v2239_v35 = vunpack.c.l.b16 %v4085_v48 }
  0xe5   : > { %v1439_v59 = vshll.u32 %v1308_v58, 16  ;;  %v1445_v16 = vshll.u32 %v1309_v45, 16  ;;  %v2568_v44 = vunpack.c.l.b16 %v2510_v0  ;;  %2222 = vrot.lane.b32.xlu1 %v2215_v7, %s3096_s15  ;;  %v4132_v3 = vunpack.c.l.b16 %v975_v21  ;;  %v874_v45 = vld [vmem:[%s3493_s13 + $0xbc] sm:$0x1]  ;;  %v877_v0 = vld [vmem:[%s3493_s13 + $0xc8] sm:$0x1] }
  0xe6   : > { %v1884_v49 = vpop.permute.xlu1 %1883  ;;  %v4134_v11 = vunpack.c.l.b16 %v989_v47  ;;  %v1438_v1 = vrot.slane %v1436_v9, 4  ;;  %v1526_v51 = vor.u32 %v1525_v31, %v1522_v38  ;;  %v933_v26 = vsel %vm3219_vm2, %v928_v56, %v932_v57  ;;  %v1332_v9 = vld [vmem:[%s3484_s8 + $0xb8] sm:$0xf] }
  0xe7   : > { %v4137_v8 = vsel %vm2112_vm8, %v2109_v23, %v1884_v49  ;;  %v4139_v15 = vpop.permute.xlu2 %1896  ;;  %v1441_v42 = vrot.slane %v1439_v59, 5  ;;  %v4145_v61 = vrot.slane %v1011_v43, 4  ;;  %v2582_v13 = vpack.c.b16 %v2568_v44, %v2568_v44 }
  0xe8   : > { %v1527_v14 = vrot.slane %v1526_v51, 4  ;;  %v4151_v60 = vrot.slane %v1014_v29, 5  ;;  %v1447_v58 = vrot.slane %v1445_v16, 5  ;;  %v1952_v27 = vpack.c.b16 %v4134_v11, %v4132_v3 }
  0xe9   : > { %1911 = vrot.lane.b32.xlu0 %v1904_v63, %s3102_s16  ;;  %v1442_v34 = vor.u32 %v1441_v42, %v1438_v1  ;;  %v4734_v43 = vunpack.c.l.b16 %v3836_v19  ;;  %v4161_v38 = vunpack.c.l.b16 %v933_v26  ;;  %v2606_v46 = vsel %vm2604_vm9, %v2582_v13, 0  ;;  %v2978_v19 = vld [vmem:[%s4671_s3 + $0x60] sm:$0xff] }
  0xea   : > { %v1882_v7 = vpop.permute.xlu0 %1881  ;;  %2987 = vmatpush.bf16.msra.mxu3 %v2606_v46  ;;  %v1528_v21 = vsel %vm3219_vm2, %v1527_v14, %v1441_v42  ;;  %v1155_v31 = vshrl.u32 %v873_v52, 16  ;;  %2639 = vmatpush.bf16.msra.mxu1 %v2606_v46  ;;  %v1158_v40 = vshll.u32 %v873_v52, 16  ;;  %v1164_v56 = vshll.u32 %v874_v45, 16  ;;  %v1335_v26 = vld [vmem:[%s3484_s8 + $0xc4] sm:$0xf]  ;;  %v2977_v52 = vld [vmem:[%s4671_s3 + $0x58] sm:$0xff] }
  0xeb   : > { %v2243_v63 = vpack.c.b16 %v2239_v35, %v4734_v43  ;;  %v4166_v29 = vsel %vm2112_vm8, %v4069_v54, %v1882_v7  ;;  %v1443_v23 = vrot.slane %v1442_v34, 4  ;;  %v1169_v47 = vshrl.u32 %v876_v37, 16  ;;  %v2878_v7 = vld [vmem:[%s3493_s13 + $0xb4] sm:$0xf] }
  0xec   : > { %v1172_v57 = vshll.u32 %v876_v37, 16  ;;  %v1157_v59 = vrot.slane %v1155_v31, 4  ;;  %v1178_v16 = vshll.u32 %v877_v0, 16  ;;  %v4179_v49 = vunpack.c.l.b16 %v1528_v21 }
  0xed   : > { %v1448_v54 = vsel %vm3219_vm2, %v1443_v23, %v1447_v58  ;;  %1959 = vrot.lane.b32.xlu1 %v1952_v27, %s3104_s28  ;;  %v4181_v1 = vrot.slane %v1158_v40, 5  ;;  %v1171_v51 = vrot.slane %v1169_v47, 4  ;;  %v2208_v42 = vpack.c.b16 %v3730_v55, %v4161_v38  ;;  %v1333_v58 = vld [vmem:[%s3484_s8 + $0xbc] sm:$0x1]  ;;  %v2961_v27 = vld [vmem:[%s3493_s13 + $0xbc] sm:$0xf0] }
  0xee   : > { %v4177_v44 = vunpack.c.l.b16 %v1448_v54  ;;  %v1972_v14 = vpack.c.b16 %v4087_v32, %v3711_v20  ;;  %2988 = vmatpush.bf16.msra.mxu3 %v2978_v19  ;;  %v4193_v34 = vrot.slane %v1172_v57, 5  ;;  %v1614_v45 = vshrl.u32 %v1332_v9, 16  ;;  %2640 = vmatpush.bf16.msra.mxu1 %v2978_v19  ;;  %v1336_v23 = vld [vmem:[%s3484_s8 + $0xc8] sm:$0x1]  ;;  %v2976_v57 = vld [vmem:[%s4671_s3 + $0x50] sm:$0xff] }
  0xef   : > { %v4186_v13 = vpop.permute.xlu2 %1937  ;;  %v2219_v37 = vpop.permute.xlu1 %2218  ;;  %v1161_v20 = vor.u32 %v4181_v1, %v1157_v59  ;;  %v1166_v32 = vrot.slane %v1164_v56, 5  ;;  %v1617_v43 = vshll.u32 %v1332_v9, 16  ;;  %v1180_v0 = vrot.slane %v1178_v16, 5 }
  0xf0   : > { %v2263_v55 = vpack.c.b16 %v4177_v44, %v3953_v18  ;;  %v1175_v46 = vor.u32 %v4193_v34, %v1171_v51  ;;  %v1616_v21 = vrot.slane %v1614_v45, 4  ;;  %v1628_v31 = vshrl.u32 %v1335_v26, 16  ;;  %v4735_v51 = vld [vmem:[#allocation2_spill] sm:$0xff] }
  0xf1   : > { %2250 = vrot.lane.b32.xlu0 %v2243_v63, %s3097_s25  ;;  %v2283_v63 = vpack.c.b16 %v4179_v49, %v4001_v30  ;;  %v1162_v18 = vrot.slane %v1161_v20, 4  ;;  %v4207_v40 = vrot.slane %v1617_v43, 5  ;;  %v1623_v56 = vshll.u32 %v1333_v58, 16  ;;  %v872_v30 = vld [vmem:[%s3493_s13 + $0xb4] sm:$0xf] }
  0xf2   : > { %v1893_v19 = vpop.permute.xlu0 %1892  ;;  %2270 = vrot.lane.b32.xlu2 %v2263_v55, %s3095_s12  ;;  %2989 = vmatpush.bf16.msra.mxu3 %v2977_v52  ;;  %v1176_v9 = vrot.slane %v1175_v46, 4  ;;  %v1630_v54 = vrot.slane %v1628_v31, 4  ;;  %v1631_v59 = vshll.u32 %v1335_v26, 16  ;;  %v2879_v16 = vor.u32 %v2961_v27, %v2878_v7  ;;  %v4223_v43 = vld [vmem:[%s3484_s8 + $0xb4] sm:$0xf] }
  0xf3   : > { %v4211_v47 = vsel %vm2121_vm10, %v4128_v25, %v1893_v19  ;;  %2641 = vmatpush.bf16.msra.mxu1 %v2977_v52  ;;  %v1889_v45 = vpack.c.b16 %v4735_v51, %v3332_v28  ;;  %v1620_v58 = vor.u32 %v4207_v40, %v1616_v21  ;;  %v1637_v55 = vshll.u32 %v1336_v23, 16  ;;  %v875_v25 = vld [vmem:[%s3493_s13 + $0xc0] sm:$0xf]  ;;  %v1331_v19 = vld [vmem:[%s3484_s8 + $0xb4] sm:$0xf] }
  0xf4   : > { %v2405_v20 = vsel %vm2063_vm3, %v2208_v42, %v2219_v37  ;;  %v1167_v46 = vsel %vm3219_vm2, %v1162_v18, %v1166_v32  ;;  %v1181_v26 = vsel %vm3219_vm2, %v1176_v9, %v1180_v0  ;;  %v4229_v52 = vrot.slane %v1631_v59, 5  ;;  %v2965_v28 = vld [vmem:[%s3484_s8 + $0xbc] sm:$0xf0]  ;;  %v2975_v42 = vld [vmem:[%s4671_s3 + $0x48] sm:$0xff] }
  0xf5   : > { %2290 = vrot.lane.b32.xlu1 %v2283_v63, %s3098_s26  ;;  %v1621_v7 = vrot.slane %v1620_v58, 4  ;;  %v1625_v27 = vrot.slane %v1623_v56, 5  ;;  %v1639_v23 = vrot.slane %v1637_v55, 5  ;;  %v1243_v21 = vshrl.u32 %v872_v30, 16  ;;  %v1334_v58 = vld [vmem:[%s3484_s8 + $0xc0] sm:$0xf] }
  0xf6   : > { %2990 = vmatpush.bf16.msra.mxu3 %v2976_v57  ;;  %v1634_v37 = vor.u32 %v4229_v52, %v1630_v54  ;;  %v1246_v32 = vshll.u32 %v872_v30, 16  ;;  %v1253_v31 = vshrl.u32 %v875_v25, 16  ;;  %v1256_v0 = vshll.u32 %v875_v25, 16 }
  0xf7   : > { %2642 = vmatpush.bf16.msra.mxu1 %v2976_v57  ;;  %v2287_v63 = vpop.permute.xlu1 %2286  ;;  %v2415_v18 = vsel %vm2076_vm4, %v2405_v20, %v4006_v33  ;;  %v4241_v56 = vpop.permute.xlu2 %2268  ;;  %v2015_v9 = vunpack.c.l.b16 %v1167_v46  ;;  %v2016_v59 = vunpack.c.l.b16 %v1181_v26  ;;  %v1245_v51 = vrot.slane %v1243_v21, 4 }
  0xf8   : > { %v2895_v55 = vor.u32 %v2965_v28, %v4223_v43  ;;  %v1635_v54 = vrot.slane %v1634_v37, 4  ;;  %v1248_v30 = vrot.slane %v1246_v32, 5  ;;  %v1255_v36 = vrot.slane %v1253_v31, 4  ;;  %v2974_v43 = vld [vmem:[%s4671_s3 + $0x40] sm:$0xff]  ;;  %v4737_v37 = vld [vmem:[#allocation4_spill] sm:$0xff] }
  0xf9   : > { %1979 = vrot.lane.b32.xlu0 %v1972_v14, %s4699_s6  ;;  %v1626_v14 = vsel %vm3219_vm2, %v1621_v7, %v1625_v27  ;;  %v1258_v57 = vrot.slane %v1256_v0, 5  ;;  %v1702_v33 = vshrl.u32 %v1331_v19, 16  ;;  %v1705_v20 = vshll.u32 %v1331_v19, 16  ;;  %v4736_v27 = vld [vmem:[#allocation3_spill] sm:$0xff]  ;;  %v4260_v19 = vld [vmem:[%s3493_s13 + $0x1c] sm:$0xf] }
  0xfa   : > { %v2267_v25 = vpop.permute.xlu0 %2266  ;;  %2007 = vrot.lane.b32.xlu2 %v2879_v16, %s4698_s30  ;;  %2991 = vmatpush.bf16.msra.mxu3 %v2975_v42  ;;  %v1640_v26 = vsel %vm3219_vm2, %v1635_v54, %v1639_v23  ;;  %v1249_v28 = vor.u32 %v1248_v30, %v1245_v51  ;;  %v1712_v21 = vshrl.u32 %v1334_v58, 16  ;;  %v2973_v16 = vld [vmem:[%s4671_s3 + $0x38] sm:$0xff]  ;;  %v2020_v7 = vpack.c.b16 %v2016_v59, %v2015_v9 }
  0xfb   : > { %v2423_v46 = vsel %vm2085_vm5, %v2415_v18, %v2267_v25  ;;  %2643 = vmatpush.bf16.msra.mxu1 %v2975_v42  ;;  %v1902_v32 = vpack.c.b16 %v4737_v37, %v4736_v27  ;;  %v1259_v31 = vor.u32 %v1258_v57, %v1255_v36  ;;  %v1704_v0 = vrot.slane %v1702_v33, 4  ;;  %2979 = vmatpush.bf16.msra.mxu2 %v2973_v16  ;;  %v4292_v27 = vld [vmem:[%s3484_s8] sm:$0xf] }
  0xfc   : > { %v2431_v23 = vsel %vm2094_vm6, %v2423_v46, %v2287_v63  ;;  %v4263_v18 = vunpack.c.l.b16 %v1626_v14  ;;  %v1250_v54 = vrot.slane %v1249_v28, 4  ;;  %v1707_v51 = vrot.slane %v1705_v20, 5  ;;  %2608 = vmatpush.bf16.msra.mxu0 %v2973_v16  ;;  %v2972_v20 = vld [vmem:[%s4671_s3 + $0x30] sm:$0xff] }
  0xfd   : > { %1894 = vrot.lane.b32.xlu1 %v1889_v45, %s3101_s14  ;;  %v2327_v30 = vunpack.c.l.b16 %v1640_v26  ;;  %v1260_v42 = vrot.slane %v1259_v31, 4  ;;  %v1714_v9 = vrot.slane %v1712_v21, 4  ;;  %v1715_v59 = vshll.u32 %v1334_v58, 16  ;;  %v4288_v21 = vld [vmem:[%s3493_s13 + $0x24] sm:$0xf] }
  0xfe   : > { %2992 = vmatpush.bf16.msra.mxu3 %v2974_v43  ;;  %v1251_v36 = vsel %vm3219_vm2, %v1250_v54, %v4181_v1  ;;  %v1708_v25 = vor.u32 %v1707_v51, %v1704_v0  ;;  %v910_v63 = vshll.u32 %v4260_v19, 16  ;;  %v1017_v14 = vor.u32 %v4151_v60, %v4145_v61  ;;  %v2971_v0 = vld [vmem:[%s4671_s3 + $0x28] sm:$0xff] }
  0xff   : > { %2644 = vmatpush.bf16.msra.mxu1 %v2974_v43  ;;  %v2355_v57 = vpop.permute.xlu1 %2354  ;;  %v4273_v45 = vpop.permute.xlu2 %2005  ;;  %v1261_v58 = vsel %vm3219_vm2, %v1260_v42, %v4193_v34  ;;  %v2035_v1 = vunpack.c.l.b16 %v1251_v36  ;;  %v1717_v33 = vrot.slane %v1715_v59, 5  ;;  %v2439_v43 = vsel %vm2103_vm7, %v2431_v23, %v4047_v17  ;;  %2980 = vmatpush.bf16.msra.mxu2 %v2972_v20 }
 0x100   : > { %v2036_v61 = vunpack.c.l.b16 %v1261_v58  ;;  %v1709_v60 = vrot.slane %v1708_v25, 4  ;;  %v4281_v46 = vrot.slane %v910_v63, 5  ;;  %v2331_v28 = vpack.c.b16 %v2327_v30, %v4263_v18  ;;  %2609 = vmatpush.bf16.msra.mxu0 %v2972_v20  ;;  %v4310_v30 = vld [vmem:[%s3484_s8 + $0xc] sm:$0xf]  ;;  %v1290_v20 = vld [vmem:[%s3484_s8 + $0x10] sm:$0xf] }
 0x101   : > { %2318 = vrot.lane.b32.xlu0 %v2895_v55, %s3099_s27  ;;  %v1018_v55 = vrot.slane %v1017_v14, 4  ;;  %v1718_v34 = vor.u32 %v1717_v33, %v1714_v9  ;;  %v4700_v16 = vunpack.c.l.b16 %v4288_v21  ;;  %v1453_v51 = vshll.u32 %v4292_v27, 16 }
 0x102   : > { %v2335_v26 = vpop.permute.xlu0 %2334  ;;  %2027 = vrot.lane.b32.xlu2 %v2020_v7, %s3107_s7  ;;  %v1710_v31 = vsel %vm3219_vm2, %v1709_v60, %v4207_v40  ;;  %v1450_v7 = vshrl.u32 %v4292_v27, 16  ;;  %v2040_v40 = vpack.c.b16 %v2036_v61, %v2035_v1  ;;  %v1460_v59 = vshrl.u32 %v4310_v30, 16  ;;  %v2970_v61 = vld [vmem:[%s4671_s3 + $0x20] sm:$0xff] }
 0x103   : > { %v2447_v37 = vsel %vm2112_vm8, %v2439_v43, %v2335_v26  ;;  %v1019_v17 = vsel %vm3219_vm2, %v1018_v55, %v4281_v46  ;;  %v1719_v18 = vrot.slane %v1718_v34, 4  ;;  %v2346_v9 = vunpack.c.l.b16 %v1710_v31  ;;  %2981 = vmatpush.bf16.msra.mxu2 %v2971_v0  ;;  %v1291_v26 = vld [vmem:[%s3484_s8 + $0x14] sm:$0x1] }
 0x104   : > { %v2455_v23 = vsel %vm2121_vm10, %v2447_v37, %v2355_v57  ;;  %v4306_v54 = vunpack.c.l.b16 %v1019_v17  ;;  %v1463_v36 = vshll.u32 %v4310_v30, 16  ;;  %v907_v14 = vshrl.u32 %v4260_v19, 16  ;;  %v1287_v57 = vld [vmem:[%s3484_s8 + $0x4] sm:$0xf]  ;;  %2610 = vmatpush.bf16.msra.mxu0 %v2971_v0 }
 0x105   : > { %1907 = vrot.lane.b32.xlu1 %v1902_v32, %s3102_s16  ;;  %v1720_v42 = vsel %vm3219_vm2, %v1719_v18, %v4229_v52  ;;  %v2463_v25 = vsel %vm2130_vm11, %v2455_v23, %v4098_v12  ;;  %v1288_v32 = vld [vmem:[%s3484_s8 + $0x8] sm:$0x1]  ;;  %v1930_v12 = vpack.c.b16 %v4700_v16, %v1923_v2  ;;  %v4332_v33 = vrot.slane %v1450_v7, 4  ;;  %v4346_v2 = vld [vmem:[%s3484_s8 + $0x60] sm:$0xf] }
 0x106   : > { %v2347_v63 = vunpack.c.l.b16 %v1720_v42  ;;  %v2212_v1 = vpack.c.b16 %v4306_v54, %v3917_v10  ;;  %v4334_v19 = vrot.slane %v1453_v51, 5  ;;  %v4340_v60 = vrot.slane %v1460_v59, 4  ;;  %v1311_v17 = vld [vmem:[%s3484_s8 + $0x64] sm:$0xf]  ;;  %v835_v18 = vld [vmem:[%s3493_s13 + $0x20] sm:$0x1] }
 0x107   : > { %v2395_v52 = vpop.permute.xlu1 %2394  ;;  %v4324_v58 = vpop.permute.xlu2 %2336  ;;  %v2232_v55 = vunpack.c.l.b16 %v4292_v27  ;;  %v4701_v10 = vunpack.c.l.b16 %v4310_v30  ;;  %v2050_v50 = vunpack.c.l.b16 %v4034_v4  ;;  %v4350_v34 = vrot.slane %v1463_v36, 5  ;;  %2982 = vmatpush.bf16.msra.mxu2 %v2970_v61  ;;  %v1312_v59 = vld [vmem:[%s3484_s8 + $0x68] sm:$0x1]  ;;  %v2969_v36 = vld [vmem:[%s4671_s3 + $0x18] sm:$0xff] }
 0x108   : > { %v1338_v37 = vshrl.u32 %v1287_v57, 16  ;;  %v1341_v31 = vshll.u32 %v1287_v57, 16  ;;  %v1736_v7 = vshrl.u32 %v4346_v2, 16  ;;  %v1347_v0 = vshll.u32 %v1288_v32, 16  ;;  %2611 = vmatpush.bf16.msra.mxu0 %v2970_v61 }
 0x109   : > { %2338 = vrot.lane.b32.xlu0 %v2331_v28, %s3100_s29  ;;  %v2351_v28 = vpack.c.b16 %v2347_v63, %v2346_v9  ;;  %v1352_v23 = vshrl.u32 %v1290_v20, 16  ;;  %v1355_v9 = vshll.u32 %v1290_v20, 16  ;;  %v1361_v57 = vshll.u32 %v1291_v26, 16 }
 0x10a   : > { %v2382_v43 = vpop.permute.xlu0 %2381  ;;  %2047 = vrot.lane.b32.xlu2 %v2040_v40, %s3108_s9  ;;  %v1340_v42 = vrot.slane %v1338_v37, 4  ;;  %v4357_v40 = vrot.slane %v1341_v31, 5  ;;  %v909_v32 = vrot.slane %v907_v14, 4  ;;  %v1722_v20 = vshrl.u32 %v1311_v17, 16 }
 0x10b   : > { %v2471_v27 = vsel %vm2139_vm12, %v2463_v25, %v2382_v43  ;;  %v1739_v25 = vshll.u32 %v4346_v2, 16  ;;  %v1354_v63 = vrot.slane %v1352_v23, 4  ;;  %v4367_v61 = vrot.slane %v1355_v9, 5  ;;  %2983 = vmatpush.bf16.msra.mxu2 %v2969_v36 }
 0x10c   : > { %v2479_v51 = vsel %vm2148_vm13, %v2471_v27, %v2395_v52  ;;  %v1344_v52 = vor.u32 %v4357_v40, %v1340_v42  ;;  %v916_v43 = vshll.u32 %v835_v18, 16  ;;  %v1349_v37 = vrot.slane %v1347_v0, 5  ;;  %2612 = vmatpush.bf16.msra.mxu0 %v2969_v36  ;;  %v2968_v18 = vld [vmem:[%s4671_s3 + $0x10] sm:$0xff] }
 0x10d   : > { %2949 = vmatmul.msk.bf16.vlgmr.msra.gmra.mxu3 %vm2157_vm14, %v2479_v51  ;;  %2358 = vrot.lane.b32.xlu1 %v2351_v28, %s3101_s14  ;;  %v913_v31 = vor.u32 %v4281_v46, %v909_v32  ;;  %v1725_v27 = vshll.u32 %v1311_v17, 16  ;;  %v1731_v16 = vshll.u32 %v1312_v59, 16  ;;  %v1358_v26 = vor.u32 %v4367_v61, %v1354_v63 }
 0x10e   : > { %v1345_v14 = vrot.slane %v1344_v52, 4  ;;  %v1363_v28 = vrot.slane %v1361_v57, 5  ;;  %v1724_v51 = vrot.slane %v1722_v20, 4  ;;  %v2361_v46 = vunpack.c.l.b16 %v4346_v2 }
 0x10f   : > { %v4371_v23 = vpop.permute.xlu1 %2220  ;;  %v914_v17 = vrot.slane %v913_v31, 4  ;;  %v918_v0 = vrot.slane %v916_v43, 5  ;;  %v4380_v9 = vrot.slane %v1725_v27, 5  ;;  %v2240_v59 = vpack.c.b16 %v4701_v10, %v2232_v55  ;;  %2984 = vmatpush.bf16.msra.mxu2 %v2968_v18  ;;  %v860_v27 = vld [vmem:[%s3493_s13 + $0x84] sm:$0xf] }
 0x110   : > { %v4377_v42 = vpop.permute.xlu2 %2356  ;;  %v1359_v36 = vrot.slane %v1358_v26, 4  ;;  %v1456_v63 = vor.u32 %v4334_v19, %v4332_v33  ;;  %v1466_v57 = vor.u32 %v4350_v34, %v4340_v60  ;;  %v1350_v2 = vsel %vm3219_vm2, %v1345_v14, %v1349_v37  ;;  %2613 = vmatpush.bf16.msra.mxu0 %v2968_v18  ;;  %v863_v18 = vld [vmem:[%s3493_s13 + $0x90] sm:$0xf]  ;;  %v1313_v10 = vld [vmem:[%s3484_s8 + $0x6c] sm:$0xf] }
 0x111   : > { %2216 = vrot.lane.b32.xlu0 %v2212_v1, %s3096_s15  ;;  %v1728_v32 = vor.u32 %v4380_v9, %v1724_v51  ;;  %v1733_v52 = vrot.slane %v1731_v16, 5  ;;  %v2054_v33 = vpack.c.b16 %v2050_v50, %v1928_v22  ;;  %v1738_v19 = vrot.slane %v1736_v7, 4 }
 0x112   : > { %v4382_v1 = vpop.permute.xlu0 %1909  ;;  %1935 = vrot.lane.b32.xlu2 %v1930_v12, %s3103_s17  ;;  %v2967_v12 = vld [vmem:[%s4671_s3 + $0x8] sm:$0xff]  ;;  %v1741_v55 = vrot.slane %v1739_v25, 5  ;;  %v1364_v60 = vsel %vm3219_vm2, %v1359_v36, %v1363_v28  ;;  %v2365_v34 = vpack.c.b16 %v2361_v46, %v2239_v35  ;;  %v919_v16 = vsel %vm3219_vm2, %v914_v17, %v918_v0  ;;  %v2966_v25 = vld [vmem:[%s4671_s3] sm:$0xff]  ;;  %v1314_v17 = vld [vmem:[%s3484_s8 + $0x70] sm:$0xf] }
 0x113   : > { %v1729_v43 = vrot.slane %v1728_v32, 4  ;;  %v2252_v20 = vunpack.c.l.b16 %v1350_v2  ;;  %v4408_v6 = vunpack.c.l.b16 %v1364_v60  ;;  %v1457_v4 = vrot.slane %v1456_v63, 4  ;;  %2985 = vmatpush.bf16.msra.mxu2 %v2967_v12 }
 0x114   : > { %v1467_v22 = vrot.slane %v1466_v57, 4  ;;  %2614 = vmatpush.bf16.msra.mxu0 %v2967_v12  ;;  %v4415_v35 = vunpack.c.l.b16 %v919_v16  ;;  %v1742_v7 = vor.u32 %v1741_v55, %v1738_v19  ;;  %v1203_v36 = vshrl.u32 %v860_v27, 16 }
 0x115   : > { %2244 = vrot.lane.b32.xlu1 %v2240_v59, %s3097_s25  ;;  %v1734_v50 = vsel %vm3219_vm2, %v1729_v43, %v1733_v52  ;;  %v2260_v26 = vpack.c.b16 %v4408_v6, %v2252_v20  ;;  %v1458_v28 = vsel %vm3219_vm2, %v1457_v4, %v4357_v40  ;;  %v861_v59 = vld [vmem:[%s3493_s13 + $0x88] sm:$0xf]  ;;  %v1206_v63 = vshll.u32 %v860_v27, 16  ;;  %v864_v52 = vld [vmem:[%s3493_s13 + $0x94] sm:$0xf] }
 0x116   : > { %v2374_v31 = vunpack.c.l.b16 %v1734_v50  ;;  %v1468_v51 = vsel %vm3219_vm2, %v1467_v22, %v4367_v61  ;;  %v1743_v46 = vrot.slane %v1742_v7, 4  ;;  %v1950_v0 = vpack.c.b16 %v4161_v38, %v4415_v35  ;;  %v1317_v61 = vld [vmem:[%s3484_s8 + $0x7c] sm:$0xf]  ;;  %v1315_v4 = vld [vmem:[%s3484_s8 + $0x74] sm:$0x1] }
 0x117   : > { %v4413_v48 = vpop.permute.xlu1 %1957  ;;  %2986 = vmatpush.bf16.msra.mxu2 %v2966_v25  ;;  %v2272_v2 = vunpack.c.l.b16 %v1458_v28  ;;  %v4439_v40 = vunpack.c.l.b16 %v1468_v51  ;;  %v1213_v32 = vshrl.u32 %v863_v18, 16  ;;  %v1205_v12 = vrot.slane %v1203_v36, 4 }
 0x118   : > { %v4420_v37 = vpop.permute.xlu2 %2370  ;;  %2615 = vmatpush.bf16.msra.mxu0 %v2966_v25  ;;  %v2378_v57 = vpack.c.b16 %v2374_v31, %v4177_v44  ;;  %v1216_v19 = vshll.u32 %v863_v18, 16  ;;  %v1530_v55 = vshrl.u32 %v1314_v17, 16  ;;  %v1744_v38 = vsel %vm3219_vm2, %v1743_v46, %v4380_v9  ;;  %v1318_v18 = vld [vmem:[%s3484_s8 + $0x80] sm:$0x1] }
 0x119   : > { %2061 = vrot.lane.b32.xlu0 %v2054_v33, %s4738_s10  ;;  %v1208_v33 = vrot.slane %v1206_v63, 5  ;;  %v1102_v60 = vshll.u32 %v861_v59, 16  ;;  %v1533_v44 = vshll.u32 %v1314_v17, 16  ;;  %v1544_v50 = vshrl.u32 %v1317_v61, 16  ;;  %v4739_v17 = vld [vmem:[#allocation7_spill] sm:$0xff] }
 0x11a   : > { %v4423_v14 = vpop.permute.xlu0 %2248  ;;  %2372 = vrot.lane.b32.xlu2 %v2365_v34, %s3102_s16  ;;  %v1215_v34 = vrot.slane %v1213_v32, 4  ;;  %v1218_v20 = vrot.slane %v1216_v19, 5  ;;  %v1532_v22 = vrot.slane %v1530_v55, 4  ;;  %v1116_v7 = vshll.u32 %v864_v52, 16 }
 0x11b   : > { %v1209_v43 = vor.u32 %v1208_v33, %v1205_v12  ;;  %v4451_v25 = vrot.slane %v1533_v44, 5  ;;  %v1547_v31 = vshll.u32 %v1317_v61, 16  ;;  %v2387_v28 = vunpack.c.l.b16 %v1744_v38  ;;  %v2962_v44 = vld [vmem:[%s3484_s8 + $0x74] sm:$0xf0] }
 0x11c   : > { %v1219_v51 = vor.u32 %v1218_v20, %v1215_v34  ;;  %v1546_v46 = vrot.slane %v1544_v50, 4  ;;  %v1539_v63 = vshll.u32 %v1315_v4, 16  ;;  %v1104_v61 = vrot.slane %v1102_v60, 5  ;;  %v2882_v34 = vld [vmem:[%s3484_s8 + $0x6c] sm:$0xf] }
 0x11d   : > { %2264 = vrot.lane.b32.xlu1 %v2260_v26, %s3095_s12  ;;  %v2280_v26 = vpack.c.b16 %v4439_v40, %v2272_v2  ;;  %v1536_v36 = vor.u32 %v4451_v25, %v1532_v22  ;;  %v4463_v32 = vrot.slane %v1547_v31, 5  ;;  %v1113_v12 = vshrl.u32 %v864_v52, 16  ;;  %v2870_v20 = vld [vmem:[%s3493_s13 + $0x84] sm:$0xf]  ;;  %v2959_v4 = vld [vmem:[%s3493_s13 + $0x8c] sm:$0xf0] }
 0x11e   : > { %v1210_v2 = vrot.slane %v1209_v43, 4  ;;  %v1118_v33 = vrot.slane %v1116_v7, 5  ;;  %v1220_v19 = vrot.slane %v1219_v51, 4  ;;  %v1553_v38 = vshll.u32 %v1318_v18, 16  ;;  %s4740_s12 = smov 88  }
 0x11f   : > { %v4448_v16 = vpop.permute.xlu1 %2288  ;;  %v1550_v55 = vor.u32 %v4463_v32, %v1546_v46  ;;  %v1537_v22 = vrot.slane %v1536_v36, 4  ;;  %v2127_v52 = vsel %vm2121_vm10, %v4137_v8, %v4139_v15  ;;  %v862_v50 = vld [vmem:[%s3493_s13 + $0x8c] sm:$0x1]  ;;  %v865_v7 = vld [vmem:[%s3493_s13 + $0x98] sm:$0x1]  ;;  %v1115_v31 = vrot.slane %v1113_v12, 4 }
 0x120   : > { %v4456_v9 = vpop.permute.xlu2 %1973  ;;  %v1211_v43 = vsel %vm3219_vm2, %v1210_v2, %v1104_v61  ;;  %v1555_v51 = vrot.slane %v1553_v38, 5  ;;  %v1108_v18 = vshll.u32 %v862_v50, 16  ;;  %v2883_v8 = vor.u32 %v2962_v44, %v2882_v34 }
 0x121   : > { %1955 = vrot.lane.b32.xlu0 %v1950_v0, %s3104_s28  ;;  %v1970_v0 = vpack.c.b16 %v4739_v17, %v4306_v54  ;;  %v2391_v54 = vpack.c.b16 %v2387_v28, %v4179_v49  ;;  %v1551_v28 = vrot.slane %v1550_v55, 4  ;;  %v1119_v17 = vor.u32 %v1118_v33, %v1115_v31 }
 0x122   : > { %2385 = vrot.lane.b32.xlu2 %v2378_v57, %s3103_s17  ;;  %v1099_v57 = vshrl.u32 %v861_v59, 16  ;;  %v1541_v59 = vrot.slane %v1539_v63, 5  ;;  %v2136_v36 = vsel %vm2130_vm11, %v2127_v52, %v4382_v1  ;;  %v2871_v63 = vor.u32 %v2959_v4, %v2870_v20 }
 0x123   : > { %v4453_v27 = vpop.permute.xlu0 %1977  ;;  %v1110_v12 = vrot.slane %v1108_v18, 5  ;;  %v1120_v50 = vrot.slane %v1119_v17, 4  ;;  %v1642_v34 = vshrl.u32 %v1313_v10, 16  ;;  %v1645_v44 = vshll.u32 %v1313_v10, 16 }
 0x124   : > { %v1101_v49 = vrot.slane %v1099_v57, 4  ;;  %v1542_v57 = vsel %vm3219_vm2, %v1537_v22, %v1541_v59  ;;  %vm2193_vm9 = vcmask 982016  }
 0x125   : > { %2284 = vrot.lane.b32.xlu1 %v2280_v26, %s3098_s26  ;;  %v1221_v26 = vsel %vm3219_vm2, %v1220_v19, %v1118_v33  ;;  %v2031_v19 = vunpack.c.l.b16 %v1211_v43  ;;  %v2320_v1 = vunpack.c.l.b16 %v1542_v57  ;;  %v1644_v43 = vrot.slane %v1642_v34, 4  ;;  %s4741_s26 = smov 96  }
 0x126   : > { %v1105_v15 = vor.u32 %v1104_v61, %v1101_v49  ;;  %v2032_v55 = vunpack.c.l.b16 %v1221_v26  ;;  %v1556_v61 = vsel %vm3219_vm2, %v1551_v28, %v1555_v51  ;;  %v2145_v51 = vsel %vm2139_vm12, %v2136_v36, %v4186_v13 }
 0x127   : > { %v4476_v60 = vpop.permute.xlu1 %2025  ;;  %v2321_v31 = vunpack.c.l.b16 %v1556_v61  ;;  %v2120_v13 = vsel %vm2112_vm8, %v4096_v41, %v3957_v5 }
 0x128   : > { %v1106_v38 = vrot.slane %v1105_v15, 4  ;;  %v2038_v17 = vpack.c.b16 %v2032_v55, %v2031_v19 }
 0x129   : > { %1975 = vrot.lane.b32.xlu0 %v1970_v0, %s4740_s12  ;;  %v1122_v0 = vshll.u32 %v865_v7, 16  ;;  %v1647_v7 = vrot.slane %v1645_v44, 5 }
 0x12a   : > { %2398 = vrot.lane.b32.xlu2 %v2391_v54, %s3104_s28  ;;  %v1316_v54 = vld [vmem:[%s3484_s8 + $0x78] sm:$0xf]  ;;  %v1111_v20 = vsel %vm3219_vm2, %v1106_v38, %v1110_v12  ;;  %v4742_v12 = vld [vmem:[#allocation10_spill] sm:$0xff]  ;;  %s2845_s8 = sshll.u32 %s4769_s18, 3 }
 0x12b   : > { %v4484_v46 = vpop.permute.xlu0 %2316  ;;  %v1124_v33 = vrot.slane %v1122_v0, 5  ;;  %v1652_v4 = vshrl.u32 %v1316_v54, 16  ;;  %v1655_v22 = vshll.u32 %v1316_v54, 16  ;;  %v2011_v52 = vunpack.c.l.b16 %v1111_v20  ;;  %v4744_v20 = vld [vmem:[#allocation5_spill] sm:$0xff] }
 0x12c   : > { %v4491_v2 = vpop.permute.xlu2 %2021  ;;  %v1648_v18 = vor.u32 %v1647_v7, %v1644_v43  ;;  %v2209_v38 = vpack.c.b16 %v4132_v3, %v4742_v12  ;;  %v2328_v54 = vpack.c.b16 %v2321_v31, %v2320_v1 }
 0x12d   : > { %2312 = vrot.lane.b32.xlu1 %v2883_v8, %s3099_s27  ;;  %v1125_v59 = vsel %vm3219_vm2, %v1120_v50, %v1124_v33  ;;  %v1654_v10 = vrot.slane %v1652_v4, 4  ;;  %v1657_v28 = vrot.slane %v1655_v22, 5  ;;  %v2154_v8 = vsel %vm2148_vm13, %v2145_v51, %v4413_v48 }
 0x12e   : > { %v2012_v26 = vunpack.c.l.b16 %v1125_v59  ;;  %v1649_v50 = vrot.slane %v1648_v18, 4  ;;  %v2408_v33 = vsel %vm2063_vm3, %v2209_v38, %v4371_v23  ;;  %v4745_v4 = vunpack.c.l.b16 %v4744_v20  ;;  %v4747_v59 = vld [vmem:[#allocation6_spill] sm:$0xff] }
 0x12f   : > { %v2046_v49 = vpop.permute.xlu1 %2045  ;;  %v1658_v57 = vor.u32 %v1657_v28, %v1654_v10  ;;  %v4746_v23 = vunpack.c.l.b16 %v4288_v21  ;;  %v4749_v21 = vld [vmem:[#allocation9_spill] sm:$0xff] }
 0x130   : > { %v2018_v0 = vpack.c.b16 %v2012_v26, %v2011_v52  ;;  %v1650_v3 = vsel %vm3219_vm2, %v1649_v50, %v4451_v25  ;;  %v4748_v52 = vunpack.c.l.b16 %v4747_v59  ;;  %v2375_v31 = vpack.c.b16 %v4749_v21, %v4408_v6 }
 0x131   : > { %2003 = vrot.lane.b32.xlu0 %v2871_v63, %s4741_s26  ;;  %v2163_v63 = vsel %vm2157_vm14, %v2154_v8, %v4453_v27  ;;  %v1659_v48 = vrot.slane %v1658_v57, 4  ;;  %v2340_v41 = vunpack.c.l.b16 %v1650_v3 }
 0x132   : > { %2023 = vrot.lane.b32.xlu2 %v2018_v0, %s3107_s7  ;;  %v2172_v27 = vsel %vm2166_vm15, %v2163_v63, %v4273_v45  ;;  %v2052_v43 = vpack.c.b16 %v4748_v52, %v4746_v23 }
 0x133   : > { %v1906_v15 = vpop.permute.xlu0 %1905  ;;  %v1660_v5 = vsel %vm3219_vm2, %v1659_v48, %v4463_v32  ;;  %v2181_v55 = vsel %vm2175_vm0, %v2172_v27, %v4476_v60  ;;  %v4743_v32 = vunpack.c.l.b16 %v4310_v30  ;;  %v2417_v60 = vsel %vm2076_vm4, %v2408_v33, %v4423_v14  ;;  %v853_v27 = vld [vmem:[%s3493_s13 + $0x68] sm:$0x1]  ;;  %s2846_s13 = sshll.u32 %s4763_s19, 6 }
 0x134   : > { %v1899_v36 = vpop.permute.xlu2 %1898  ;;  %v2341_v61 = vunpack.c.l.b16 %v1660_v5  ;;  %v2190_v25 = vsel %vm2184_vm1, %v2181_v55, %v2046_v49  ;;  %v2425_v7 = vsel %vm2085_vm5, %v2417_v60, %v4241_v56  ;;  %v4750_v56 = vld [vmem:[#allocation8_spill] sm:$0xff]  ;;  %v2132_v18 = vsel %vm2130_vm11, %v4211_v47, %v1906_v15 }
 0x135   : > { %v2129_v19 = vsel %vm2121_vm10, %v2120_v13, %v1899_v36  ;;  %2043 = vrot.lane.b32.xlu1 %v2038_v17, %s3108_s9  ;;  %v2362_v22 = vpack.c.b16 %v4745_v4, %v4743_v32  ;;  %v2433_v30 = vsel %vm2094_vm6, %v2425_v7, %v4448_v16  ;;  %v2388_v51 = vpack.c.b16 %v4750_v56, %v4439_v40 }
 0x136   : > { %v2348_v44 = vpack.c.b16 %v2341_v61, %v2340_v41  ;;  %v2441_v49 = vsel %vm2103_vm7, %v2433_v30, %v4484_v46  ;;  %v1272_v41 = vshll.u32 %v853_v27, 16 }
 0x137   : > { %v2060_v45 = vpop.permute.xlu1 %2059  ;;  %v2449_v28 = vsel %vm2112_vm8, %v2441_v49, %v4324_v58 }
 0x138   : > { %v2201_v34 = vsel %vm2193_vm9, %v2190_v25, %v2060_v45  ;;  %v2457_v16 = vsel %vm2121_vm10, %v2449_v28, %v4377_v42  ;;  %v1274_v33 = vrot.slane %v1272_v41, 5 }
 0x139   : > { %2332 = vrot.lane.b32.xlu0 %v2328_v54, %s3100_s29  ;;  %2626 = vmatmul.bf16.vlgmr.msra.gmra.mxu2 %v2201_v34  ;;  %v2465_v6 = vsel %vm2130_vm11, %v2457_v16, %v4420_v37 }
 0x13a   : > { %2352 = vrot.lane.b32.xlu2 %v2348_v44, %s3101_s14  ;;  %s361_s14 = sadd.s32 %s2846_s13, %s2845_s8 }
 0x13b   : > { %v1934_v1 = vpop.permute.xlu0 %1933 }
 0x13c   : > { %v1940_v10 = vpop.permute.xlu2 %1939  ;;  %v2141_v8 = vsel %vm2139_vm12, %v2132_v18, %v1934_v1 }
 0x13d   : > { %2366 = vrot.lane.b32.xlu1 %v2362_v22, %s3102_s16  ;;  %s2847_s16 = sshll.u32 %s361_s14, 2 }
 0x13e   : > { %s4635_s7 = scalar_lea.vmem %s4673_s5, %s2847_s16 }
 0x13f   : > { %v2384_v14 = vpop.permute.xlu1 %2383 }
 0x140   : > { %v2473_v58 = vsel %vm2139_vm12, %v2465_v6, %v2384_v14 }
 0x141   : > { %2057 = vrot.lane.b32.xlu0 %v2052_v43, %s4738_s10 }
 0x142   : > { %2379 = vrot.lane.b32.xlu2 %v2375_v31, %s3103_s17 }
 0x143   : > { %v1954_v26 = vpop.permute.xlu0 %1953 }
 0x144   : > { %v2150_v40 = vsel %vm2148_vm13, %v2141_v8, %v1954_v26 }
 0x145   : > { %v2159_v57 = vsel %vm2157_vm14, %v2150_v40, %v4456_v9 }
 0x147   : > { %v2002_v46 = vpop.permute.xlu1 %2001 }
 0x148   : > { %v2168_v47 = vsel %vm2166_vm15, %v2159_v57, %v2002_v46 }
 0x149   : > { %2392 = vrot.lane.b32.xlu0 %v2388_v51, %s3104_s28  ;;  %v2177_v12 = vsel %vm2175_vm0, %v2168_v47, %v4491_v2  ;;  %v4751_v2 = vor.u32 %v4045_v62, %v4043_v24 }
 0x14b   : > { %v2397_v17 = vpop.permute.xlu0 %2396  ;;  %v1270_v61 = vrot.slane %v4751_v2, 4 }
 0x14c   : > { %v2481_v0 = vsel %vm2148_vm13, %v2473_v58, %v2397_v17  ;;  %v2271_v42 = vpop.permute.xlu2 %2270 }
 0x14d   : > { %2950 = vmatmul.msk.bf16.gmra.mxu3 %vm2157_vm14, %v2481_v0  ;;  %v1275_v34 = vsel %vm3219_vm2, %v1270_v61, %v1274_v33  ;;  %vm2682_vm2 = vcmask 125952  }
 0x14f   : > { %v2056_v15 = vpop.permute.xlu1 %2055 }
 0x153   : > { %v2042_v37 = vpop.permute.xlu0 %2041 }
 0x154   : > { %v2186_v38 = vsel %vm2184_vm1, %v2177_v12, %v2042_v37  ;;  %v2008_v50 = vpop.permute.xlu2 %2007 }
 0x155   : > { %v2195_v63 = vsel %vm2193_vm9, %v2186_v38, %v2056_v15  ;;  %v2207_v15 = vpack.c.b16 %v4415_v35, %v3964_v53 }
 0x156   : > { %2616 = vmatmul.bf16.vlgmr.msra.gmra.mxu0 %v2195_v63 }
 0x157   : > { %v2223_v13 = vpop.permute.xlu1 %2222 }
 0x15b   : > { %v1912_v36 = vpop.permute.xlu0 %1911 }
 0x15c   : > { %v2138_v54 = vsel %vm2130_vm11, %v2129_v19, %v1912_v36  ;;  %v2028_v48 = vpop.permute.xlu2 %2027  ;;  %v2206_v19 = vunpack.c.l.b16 %v1275_v34 }
 0x15d   : > { %v2147_v9 = vsel %vm2139_vm12, %v2138_v54, %v1940_v10 }
 0x15e   : > { %v2210_v20 = vpack.c.b16 %v2206_v19, %v4134_v11 }
 0x15f   : > { %v1960_v3 = vpop.permute.xlu1 %1959 }
 0x160   : > { %v2411_v22 = vsel %vm2063_vm3, %v2210_v20, %v2223_v13  ;;  %v2156_v30 = vsel %vm2148_vm13, %v2147_v9, %v1960_v3 }
 0x163   : > { %v2251_v5 = vpop.permute.xlu0 %2250 }
 0x164   : > { %v2048_v55 = vpop.permute.xlu2 %2047  ;;  %v2419_v23 = vsel %vm2076_vm4, %v2411_v22, %v2251_v5 }
 0x165   : > { %v2427_v43 = vsel %vm2085_vm5, %v2419_v23, %v2271_v42 }
 0x167   : > { %v2291_v25 = vpop.permute.xlu1 %2290 }
 0x168   : > { %v2435_v7 = vsel %vm2094_vm6, %v2427_v43, %v2291_v25 }
 0x16b   : > { %v1980_v45 = vpop.permute.xlu0 %1979 }
 0x16c   : > { %v1936_v44 = vpop.permute.xlu2 %1935  ;;  %v2165_v14 = vsel %vm2157_vm14, %v2156_v30, %v1980_v45 }
 0x16d   : > { %v2174_v28 = vsel %vm2166_vm15, %v2165_v14, %v2008_v50 }
 0x16e   : > { %v2183_v16 = vsel %vm2175_vm0, %v2174_v28, %v2028_v48 }
 0x16f   : > { %v1895_v1 = vpop.permute.xlu1 %1894  ;;  %v2192_v6 = vsel %vm2184_vm1, %v2183_v16, %v2048_v55 }
 0x170   : > { %v2125_v60 = vsel %vm2121_vm10, %v4166_v29, %v1895_v1 }
 0x173   : > { %v2319_v32 = vpop.permute.xlu0 %2318 }
 0x174   : > { %v2373_v4 = vpop.permute.xlu2 %2372  ;;  %v2443_v11 = vsel %vm2103_vm7, %v2435_v7, %v2319_v32  ;;  %v3052_v32 = vld [vmem:[%s4672_s4] ss:$0 sm:$0xff] }
 0x177   : > { %v1908_v24 = vpop.permute.xlu1 %1907 }
 0x178   : > { %v2134_v62 = vsel %vm2130_vm11, %v2125_v60, %v1908_v24 }
 0x179   : > { %v2143_v39 = vsel %vm2139_vm12, %v2134_v62, %v1936_v44 }
 0x17b   : > { %v2339_v59 = vpop.permute.xlu0 %2338 }
 0x17c   : > { %v2386_v52 = vpop.permute.xlu2 %2385  ;;  %v2451_v49 = vsel %vm2112_vm8, %v2443_v11, %v2339_v59 }
 0x17f   : > { %v2359_v29 = vpop.permute.xlu1 %2358 }
 0x180   : > { %v2459_v21 = vsel %vm2121_vm10, %v2451_v49, %v2359_v29 }
 0x181   : > { %v2467_v31 = vsel %vm2130_vm11, %v2459_v21, %v2373_v4 }
 0x182   : > { %v2475_v10 = vsel %vm2139_vm12, %v2467_v31, %v2386_v52 }
 0x183   : > { %v2217_v26 = vpop.permute.xlu0 %2216 }
 0x184   : > { %v2399_v56 = vpop.permute.xlu2 %2398  ;;  %v2402_v13 = vsel %vm2063_vm3, %v2207_v15, %v2217_v26 }
 0x185   : > { %v2483_v51 = vsel %vm2148_vm13, %v2475_v10, %v2399_v56 }
 0x186   : > { %2951 = vmatmul.msk.bf16.gmra.mxu3 %vm2157_vm14, %v2483_v51 }
 0x187   : > { %v2245_v46 = vpop.permute.xlu1 %2244 }
 0x188   : > { %v2413_v54 = vsel %vm2076_vm4, %v2402_v13, %v2245_v46 }
 0x18b   : > { %v2062_v18 = vpop.permute.xlu0 %2061 }
 0x18c   : > { %v2204_v8 = vsel %vm2193_vm9, %v2192_v6, %v2062_v18  ;;  %v2024_v47 = vpop.permute.xlu2 %2023 }
 0x18d   : > { %2631 = vmatmul.bf16.gmra.mxu2 %v2204_v8 }
 0x18f   : > { %v2265_v58 = vpop.permute.xlu1 %2264 }
 0x190   : > { %v2421_v48 = vsel %vm2085_vm5, %v2413_v54, %v2265_v58  ;;  %v2651_v44 = vpop.f32.mrf.mxu3 }
 0x193   : > { %v1956_v17 = vpop.permute.xlu0 %1955 }
 0x194   : > { %v2152_v38 = vsel %vm2148_vm13, %v2143_v39, %v1956_v17  ;;  %v2353_v50 = vpop.permute.xlu2 %2352 }
 0x197   : > { %v2285_v40 = vpop.permute.xlu1 %2284 }
 0x198   : > { %v2429_v9 = vsel %vm2094_vm6, %v2421_v48, %v2285_v40  ;;  %v2653_v19 = vpop.f32.mrf.mxu3 }
 0x19b   : > { %v1976_v0 = vpop.permute.xlu0 %1975 }
 0x19c   : > { %v2161_v63 = vsel %vm2157_vm14, %v2152_v38, %v1976_v0  ;;  %v2380_v33 = vpop.permute.xlu2 %2379 }
 0x19f   : > { %v2313_v42 = vpop.permute.xlu1 %2312 }
 0x1a0   : > { %v2437_v53 = vsel %vm2103_vm7, %v2429_v9, %v2313_v42 }
 0x1a3   : > { %v2004_v57 = vpop.permute.xlu0 %2003 }
 0x1a4   : > { %v2170_v36 = vsel %vm2166_vm15, %v2161_v63, %v2004_v57 }
 0x1a5   : > { %v2179_v3 = vsel %vm2175_vm0, %v2170_v36, %v2024_v47 }
 0x1a7   : > { %v2044_v37 = vpop.permute.xlu1 %2043 }
 0x1a8   : > { %v2188_v35 = vsel %vm2184_vm1, %v2179_v3, %v2044_v37 }
 0x1ab   : > { %v2333_v12 = vpop.permute.xlu0 %2332 }
 0x1ac   : > { %v2445_v5 = vsel %vm2112_vm8, %v2437_v53, %v2333_v12 }
 0x1ad   : > { %v2453_v2 = vsel %vm2121_vm10, %v2445_v5, %v2353_v50 }
 0x1af   : > { %v2367_v55 = vpop.permute.xlu1 %2366 }
 0x1b0   : > { %v2461_v61 = vsel %vm2130_vm11, %v2453_v2, %v2367_v55 }
 0x1b1   : > { %v2469_v25 = vsel %vm2139_vm12, %v2461_v61, %v2380_v33 }
 0x1b3   : > { %v2058_v27 = vpop.permute.xlu0 %2057 }
 0x1b4   : > { %v2198_v41 = vsel %vm2193_vm9, %v2188_v35, %v2058_v27 }
 0x1b5   : > { %2621 = vmatmul.bf16.gmra.mxu0 %v2198_v41 }
 0x1bb   : > { %v2393_v45 = vpop.permute.xlu0 %2392 }
 0x1bc   : > { %v2477_v34 = vsel %vm2148_vm13, %v2469_v25, %v2393_v45  ;;  %v2627_v1 = vpop.f32.mrf.mxu2 }
 0x1bd   : > { %2948 = vmatmul.msk.bf16.vlgmr.msra.gmra.mxu1 %vm2157_vm14, %v2477_v34  ;;  %v2628_v20 = vadd.f32 %v3052_v32, %v2627_v1 }
 0x1c4   : > { %v2629_v24 = vpop.f32.mrf.mxu2 }
 0x1c5   : > { %v2630_v23 = vadd.f32 %v3052_v32, %v2629_v24 }
 0x1d0   : > { %v2656_v4 = vpop.f32.mrf.mxu3 }
 0x1d1   : > { %v2657_v22 = vadd.f32 %v2656_v4, %v2628_v20 }
 0x1d3   : > { %v2670_v60 = vmax.f32 %v2657_v22, 0.0  ;;  %v2617_v51 = vpop.f32.mrf.mxu0 }
 0x1d4   : > { %v2618_v58 = vadd.f32 %v3052_v32, %v2617_v51 }
 0x1d5   : > { %v2678_v62 = vpack.c.bf16 %v2670_v60, %v2670_v60 }
 0x1d7   : > { %2687 = vst.msk [vmem:[%s4635_s7 + $0x10] sm:$0xf] %vm2682_vm2, %v2678_v62 }
 0x1d8   : > { %v2658_v59 = vpop.f32.mrf.mxu3 }
 0x1d9   : > { %v2659_v39 = vadd.f32 %v2658_v59, %v2630_v23 }
 0x1db   : > { %v2671_v52 = vmax.f32 %v2659_v39, 0.0  ;;  %v2619_v16 = vpop.f32.mrf.mxu0 }
 0x1dc   : > { %v2620_v38 = vadd.f32 %v3052_v32, %v2619_v16 }
 0x1dd   : > { %v2679_v43 = vpack.c.bf16 %v2671_v52, %v2671_v52 }
 0x1df   : > { %2688 = vst.msk [vmem:[%s4635_s7 + $0x14] sm:$0xf] %vm2682_vm2, %v2679_v43 }
 0x209   : > { %v2661_v7 = vpop.f32.mrf.mxu3 }
 0x210   : > { %v2632_v11 = vpop.f32.mrf.mxu2 }
 0x211   : > { %v2633_v30 = vadd.f32 %v3052_v32, %v2632_v11  ;;  %v2663_v26 = vpop.f32.mrf.mxu3 }
 0x213   : > { %v2662_v49 = vadd.f32 %v2661_v7, %v2633_v30 }
 0x215   : > { %v2672_v29 = vmax.f32 %v2662_v49, 0.0 }
 0x217   : > { %v2680_v14 = vpack.c.bf16 %v2672_v29, %v2672_v29 }
 0x218   : > { %v2634_v21 = vpop.f32.mrf.mxu2 }
 0x219   : > { %2689 = vst.msk [vmem:[%s4635_s7 + $0x18] sm:$0xf] %vm2682_vm2, %v2680_v14  ;;  %v2635_v31 = vadd.f32 %v3052_v32, %v2634_v21 }
 0x21b   : > { %v2664_v10 = vadd.f32 %v2663_v26, %v2635_v31 }
 0x21d   : > { %v2673_v28 = vmax.f32 %v2664_v10, 0.0 }
 0x21f   : > { %v2681_v56 = vpack.c.bf16 %v2673_v28, %v2673_v28 }
 0x221   : > { %2690 = vst.msk [vmem:[%s4635_s7 + $0x1c] sm:$0xf] %vm2682_vm2, %v2681_v56 }
 0x232   : > { %v2622_v46 = vpop.f32.mrf.mxu0 }
 0x233   : > { %v2623_v18 = vadd.f32 %v3052_v32, %v2622_v46 }
 0x235   : > { %v2652_v6 = vadd.f32 %v2651_v44, %v2623_v18 }
 0x237   : > { %v2668_v8 = vmax.f32 %v2652_v6, 0.0 }
 0x239   : > { %v2676_v17 = vpack.c.bf16 %v2668_v8, %v2668_v8 }
 0x23a   : > { %v2624_v40 = vpop.f32.mrf.mxu0  ;;  %v2646_v0 = vpop.f32.mrf.mxu1 }
 0x23b   : > { %2685 = vst.msk [vmem:[%s4635_s7 + $0x8] sm:$0xf] %vm2682_vm2, %v2676_v17  ;;  %v2625_v42 = vadd.f32 %v3052_v32, %v2624_v40  ;;  %v2647_v57 = vadd.f32 %v2646_v0, %v2618_v58 }
 0x23d   : > { %v2654_v47 = vadd.f32 %v2653_v19, %v2625_v42  ;;  %v2666_v15 = vmax.f32 %v2647_v57, 0.0 }
 0x23f   : > { %v2669_v37 = vmax.f32 %v2654_v47, 0.0  ;;  %v2674_v12 = vpack.c.bf16 %v2666_v15, %v2666_v15 }
 0x241   : > { %v2677_v63 = vpack.c.bf16 %v2669_v37, %v2669_v37  ;;  %2683 = vst.msk [vmem:[%s4635_s7] sm:$0xf] %vm2682_vm2, %v2674_v12 }
 0x242   : > { %v2648_v50 = vpop.f32.mrf.mxu1 }
 0x243   : > { %2686 = vst.msk [vmem:[%s4635_s7 + $0xc] sm:$0xf] %vm2682_vm2, %v2677_v63  ;;  %v2649_v13 = vadd.f32 %v2648_v50, %v2620_v38 }
 0x245   : > { %v2667_v36 = vmax.f32 %v2649_v13, 0.0 }
 0x247   : > { %v2675_v54 = vpack.c.bf16 %v2667_v36, %v2667_v36 }
 0x249   : > { %2684 = vst.msk [vmem:[%s4635_s7 + $0x4] sm:$0xf] %vm2682_vm2, %v2675_v54 }
 0x24a PF: > { %s15_s22 = sadd.s32 1, %s3093_s22   ;;  %s4752_s18 = smov %s3085_s20 }
 0x24b   : > { %p12_p10 = scmp.ge.s32.totalorder %s15_s22, 18   ;;  %s4753_s19 = smov %s3089_s21 }
 0x24c   : > { %s4754_s20 = smov %s4757_s23  ;;  %s4755_s21 = smov %s4761_s24 }
 0x24d   :  { %14 = sbr.rel (!%p12_p10) target bundleno = 3 (0x3), region = 76 }

</bundles_post_ra>
